<compile_context>
chip_gen: v5e
topology: v5e:2x2
jax: 0.10.0
libtpu: 0.0.40
codegen_flags: <defaults>
</compile_context>

<pallas_src>
import functools

import jax
import jax.numpy as jnp
from jax import lax
from jax.experimental import pallas as pl
from jax.experimental.pallas import tpu as pltpu


def _round_up(x, m):
    return (x + m - 1) // m * m


# ----------------------------------------------------------------------------
# Fused kernel.
#   Grid: (batch_tiles, time_chunks), semantics ("parallel", "arbitrary").
#   x_ref  : (Tc*Bt, Din)  bf16   time-major rows for this (batch-tile, time-chunk)
#   wih1   : (Din, G) bf16, whh1: (Hp, G) bf16, b1: (1, G) f32      (G = 4*Hp)
#   w2     : (2*Hp, G) bf16  merged [wih2; whh2], b2: (1, G) f32
#   fc1w   : (Hp, F) bf16, fc1b/gamma/beta/mean/var: (1, F) f32
#   fc2w   : (F, Cp) bf16, fc2b: (1, Cp) f32
#   out    : (Bt, Cp) f32   written on the last time-chunk of each batch tile
#   scratch: gx (Tc*Bt, G) f32, h1/c1/h2/c2 (Bt, Hp) f32
# Gate order along the gate axis matches PyTorch: [i, f, g, o].
# ----------------------------------------------------------------------------
def fused_lstm_head_kernel(
    x_ref,
    wih1_ref, whh1_ref, b1_ref,
    w2_ref, b2_ref,
    fc1w_ref, fc1b_ref,
    gamma_ref, beta_ref, mean_ref, var_ref,
    fc2w_ref, fc2b_ref,
    out_ref,
    gx_ref, h1_ref, c1_ref, h2_ref, c2_ref,
    *, tc, bt, hp, packed, unroll,
):
    t_idx = pl.program_id(1)
    n_t = pl.num_programs(1)

    # Fresh h/c state at the first time-chunk of every batch tile.
    @pl.when(t_idx == 0)
    def _init():
        h1_ref[...] = jnp.zeros_like(h1_ref)
        c1_ref[...] = jnp.zeros_like(c1_ref)
        h2_ref[...] = jnp.zeros_like(h2_ref)
        c2_ref[...] = jnp.zeros_like(c2_ref)

    # Hoisted layer-1 input projection for the whole chunk: one big bf16 MXU matmul,
    # f32 accumulation; bias folded in once per chunk.
    gx_ref[...] = (
        jnp.dot(x_ref[...], wih1_ref[...], preferred_element_type=jnp.float32)
        + b1_ref[...]
    )

    def cell(gates, c):
        if packed:
            # Whole-slab sigmoid + tanh (one vreg each when 4*Hp == 128), then slice.
            sig = jax.nn.sigmoid(gates)
            th = jnp.tanh(gates)
            i_g = sig[:, 0 * hp:1 * hp]
            f_g = sig[:, 1 * hp:2 * hp]
            g_g = th[:, 2 * hp:3 * hp]
            o_g = sig[:, 3 * hp:4 * hp]
        else:
            i_g = jax.nn.sigmoid(gates[:, 0 * hp:1 * hp])
            f_g = jax.nn.sigmoid(gates[:, 1 * hp:2 * hp])
            g_g = jnp.tanh(gates[:, 2 * hp:3 * hp])
            o_g = jax.nn.sigmoid(gates[:, 3 * hp:4 * hp])
        c_new = f_g * c + i_g * g_g
        h_new = o_g * jnp.tanh(c_new)
        return h_new, c_new

    def step(t, carry):
        h1, c1, h2, c2 = carry
        row = pl.multiple_of(t * bt, bt)
        gx = gx_ref[pl.ds(row, bt), :]                      # precomputed x@W_ih + b1
        # Recurrent weights are read from their refs inside the loop (no value hoist).
        g1 = gx + jnp.dot(h1.astype(jnp.bfloat16), whh1_ref[...],
                          preferred_element_type=jnp.float32)
        h1, c1 = cell(g1, c1)
        h1b = h1.astype(jnp.bfloat16)
        if packed:
            # Sub-128-lane layout: slice the merged weight on sublanes (static, cheap).
            g2 = (jnp.dot(h1b, w2_ref[0:hp, :], preferred_element_type=jnp.float32)
                  + jnp.dot(h2.astype(jnp.bfloat16), w2_ref[hp:2 * hp, :],
                            preferred_element_type=jnp.float32)
                  + b2_ref[...])
        else:
            # 128-aligned layout: single merged matmul [h1 | h2] @ [wih2; whh2].
            h12 = jnp.concatenate([h1, h2], axis=-1).astype(jnp.bfloat16)
            g2 = (jnp.dot(h12, w2_ref[...], preferred_element_type=jnp.float32)
                  + b2_ref[...])
        h2, c2 = cell(g2, c2)
        return h1, c1, h2, c2

    carry = (h1_ref[...], c1_ref[...], h2_ref[...], c2_ref[...])
    h1, c1, h2, c2 = lax.fori_loop(0, tc, step, carry, unroll=unroll)
    h1_ref[...] = h1
    c1_ref[...] = c1
    h2_ref[...] = h2
    c2_ref[...] = c2

    # Fused head on the last time-chunk: fc1 -> BN(eval) -> ReLU -> fc2.
    @pl.when(t_idx == n_t - 1)
    def _head():
        eps = 1e-5
        z = (jnp.dot(h2.astype(jnp.bfloat16), fc1w_ref[...],
                     preferred_element_type=jnp.float32) + fc1b_ref[...])
        z = (z - mean_ref[...]) * lax.rsqrt(var_ref[...] + eps) * gamma_ref[...] + beta_ref[...]
        z = jnp.maximum(z, 0.0)
        out_ref[...] = (
            jnp.dot(z.astype(jnp.bfloat16), fc2w_ref[...],
                    preferred_element_type=jnp.float32) + fc2b_ref[...]
        ).astype(out_ref.dtype)


# ----------------------------------------------------------------------------
# Wrapper-side weight layout: PyTorch-shaped weights -> gate-padded, transposed blocks.
# Gate k occupies columns [k*Hp, k*Hp + H); padded columns / rows / bias entries are zero.
# ----------------------------------------------------------------------------
def _pad_gate_cols(w_t, H, hp):
    rows = w_t.shape[0]
    w3 = w_t.reshape(rows, 4, H)
    out = jnp.zeros((rows, 4, hp), jnp.float32).at[:, :, :H].set(w3.astype(jnp.float32))
    return out.reshape(rows, 4 * hp)


def _prep_lstm_weights(w_ih, w_hh, b_ih, b_hh, H, hp, pad_in_rows):
    wih_t = jnp.transpose(w_ih).astype(jnp.float32)          # (Din or H, 4H)
    whh_t = jnp.transpose(w_hh).astype(jnp.float32)          # (H, 4H)
    wih_p = _pad_gate_cols(wih_t, H, hp)                     # (rows, 4*hp)
    whh_p = _pad_gate_cols(whh_t, H, hp)                     # (H, 4*hp)
    whh_p = jnp.zeros((hp, 4 * hp), jnp.float32).at[:H, :].set(whh_p)
    if pad_in_rows:                                          # layer >= 2: input is padded h
        wih_p = jnp.zeros((hp, 4 * hp), jnp.float32).at[:wih_t.shape[0], :].set(wih_p)
    bias = (b_ih + b_hh).astype(jnp.float32).reshape(1, 4 * H)
    bias_p = _pad_gate_cols(bias, H, hp)                     # (1, 4*hp)
    return wih_p, whh_p, bias_p


def _pick_batch_tile(bp):
    # Prefer >= 2 batch tiles when possible (v7x has 2 TensorCores); tiles are multiples of 8.
    if bp <= 8:
        return bp
    target = max(8, _round_up(bp // 2, 8))
    bt = 8
    for d in range(8, target + 1, 8):
        if bp % d == 0:
            bt = d
    return bt


def _pick_t_chunk(T, bt, hp, din, requested=None, budget_bytes=12 * 1024 * 1024):
    # Per-timestep resident bytes: gx row (f32) + double-buffered streamed bf16 x rows.
    per_t = bt * (4 * hp * 4 + 2 * 2 * din)
    cap = max(1, int(budget_bytes // max(per_t, 1)))
    tc = min(T if requested is None else requested, T, cap)
    tc = max(1, tc)
    while T % tc:
        tc -= 1
    return tc


# ----------------------------------------------------------------------------
# Full model forward (eval-mode semantics).
# ----------------------------------------------------------------------------
def lstm_model_forward(x, params, hidden_size, num_layers, num_classes, t_chunk=None):
    """x: (B, T, input_size) float32 -> logits (B, num_classes)."""
    assert num_layers == 2, "fused kernel implements the module's 2-layer configuration"
    B, T, Din = x.shape
    H = hidden_size

    # Packed gate layout when all 4 gates fit one 128-lane vreg; else 128 lanes per gate.
    if 4 * H <= 128:
        Hp = 32
    else:
        Hp = _round_up(H, 128)
    packed = 4 * Hp <= 128
    G = 4 * Hp

    Bp = _round_up(max(B, 1), 8)
    Bt = _pick_batch_tile(Bp)
    n_bt = Bp // Bt
    FC1 = params["fc1_w"].shape[0]                 # 128
    Cp = _round_up(max(num_classes, 1), 128)       # lane-dense output slab

    tc = _pick_t_chunk(T, Bt, Hp, Din, t_chunk)
    n_chunks = T // tc
    unroll = tc if tc <= 8 else 8

    # x: (B,T,D) -> batch-tile-major, time-major rows: (n_bt*T*Bt, Din), bf16.
    x_p = jnp.zeros((Bp, T, Din), jnp.float32).at[:B].set(x.astype(jnp.float32))
    x_p = x_p.reshape(n_bt, Bt, T, Din).transpose(0, 2, 1, 3)      # (n_bt, T, Bt, Din)
    x2d = x_p.reshape(n_bt * T * Bt, Din).astype(jnp.bfloat16)

    wih1, whh1, b1 = _prep_lstm_weights(params["w_ih_l0"], params["w_hh_l0"],
                                        params["b_ih_l0"], params["b_hh_l0"],
                                        H, Hp, pad_in_rows=False)
    wih2, whh2, b2 = _prep_lstm_weights(params["w_ih_l1"], params["w_hh_l1"],
                                        params["b_ih_l1"], params["b_hh_l1"],
                                        H, Hp, pad_in_rows=True)
    w2 = jnp.concatenate([wih2, whh2], axis=0)                     # merged (2*Hp, G)

    wih1 = wih1.astype(jnp.bfloat16)
    whh1 = whh1.astype(jnp.bfloat16)
    w2 = w2.astype(jnp.bfloat16)

    fc1w = jnp.zeros((Hp, FC1), jnp.float32).at[:H, :].set(
        jnp.transpose(params["fc1_w"]).astype(jnp.float32)).astype(jnp.bfloat16)
    fc1b = params["fc1_b"].astype(jnp.float32).reshape(1, FC1)
    gamma = params["bn_gamma"].astype(jnp.float32).reshape(1, FC1)
    beta = params["bn_beta"].astype(jnp.float32).reshape(1, FC1)
    mean = params["bn_mean"].astype(jnp.float32).reshape(1, FC1)
    var = params["bn_var"].astype(jnp.float32).reshape(1, FC1)
    fc2w = jnp.zeros((FC1, Cp), jnp.float32).at[:, :num_classes].set(
        jnp.transpose(params["fc2_w"]).astype(jnp.float32)).astype(jnp.bfloat16)
    fc2b = jnp.zeros((1, Cp), jnp.float32).at[:, :num_classes].set(
        params["fc2_b"].astype(jnp.float32).reshape(1, -1))

    kernel = functools.partial(
        fused_lstm_head_kernel, tc=tc, bt=Bt, hp=Hp, packed=packed, unroll=unroll)

    def full(arr):
        # Whole-array block, constant block index -> resident in VMEM across the grid.
        nd = arr.ndim
        return pl.BlockSpec(arr.shape, lambda b, t, _nd=nd: (0,) * _nd)

    grid_spec = pltpu.PrefetchScalarGridSpec(
        num_scalar_prefetch=0,
        grid=(n_bt, n_chunks),
        in_specs=[
            # Streamed x rows for (batch tile b, time chunk t).
            pl.BlockSpec((tc * Bt, Din), lambda b, t, _n=n_chunks: (b * _n + t, 0)),
            full(wih1), full(whh1), full(b1),
            full(w2), full(b2),
            full(fc1w), full(fc1b),
            full(gamma), full(beta), full(mean), full(var),
            full(fc2w), full(fc2b),
        ],
        out_specs=pl.BlockSpec((Bt, Cp), lambda b, t: (b, 0)),
        scratch_shapes=[
            pltpu.VMEM((tc * Bt, G), jnp.float32),   # hoisted x@W_ih projections
            pltpu.VMEM((Bt, Hp), jnp.float32),       # h1
            pltpu.VMEM((Bt, Hp), jnp.float32),       # c1
            pltpu.VMEM((Bt, Hp), jnp.float32),       # h2
            pltpu.VMEM((Bt, Hp), jnp.float32),       # c2
        ],
    )

    out_padded = pl.pallas_call(
        kernel,
        out_shape=jax.ShapeDtypeStruct((Bp, Cp), jnp.float32),
        grid_spec=grid_spec,
        compiler_params=pltpu.CompilerParams(
            # Batch tiles are independent (v7x megacore); the time recurrence is serial.
            dimension_semantics=("parallel", "arbitrary"),
            # Explicit scoped-VMEM limit: above v5e(16)/v6e,v7x(32) MiB defaults, within
            # v7x's 64 MiB physical. t_chunk is budgeted against ~12 MiB of streamed state.
            vmem_limit_bytes=48 * 1024 * 1024,
        ),
    )(x2d, wih1, whh1, b1, w2, b2,
      fc1w, fc1b, gamma, beta, mean, var, fc2w, fc2b)

    return out_padded[:B, :num_classes]


# ----------------------------------------------------------------------------
# Pure-JAX reference (mirrors the kernel's bf16 matmul-operand casts, f32 elsewhere).
# ----------------------------------------------------------------------------
def lstm_model_reference(x, params, hidden_size, num_layers, num_classes):
    B, T, Din = x.shape
    H = hidden_size

    def dotf(a, b):
        return jnp.dot(a.astype(jnp.bfloat16), b.astype(jnp.bfloat16),
                       preferred_element_type=jnp.float32)

    def cell(g, c):
        i = jax.nn.sigmoid(g[:, 0 * H:1 * H])
        f = jax.nn.sigmoid(g[:, 1 * H:2 * H])
        gg = jnp.tanh(g[:, 2 * H:3 * H])
        o = jax.nn.sigmoid(g[:, 3 * H:4 * H])
        c = f * c + i * gg
        return o * jnp.tanh(c), c

    hs = [jnp.zeros((B, H), jnp.float32) for _ in range(num_layers)]
    cs = [jnp.zeros((B, H), jnp.float32) for _ in range(num_layers)]
    xt = x.astype(jnp.float32)
    for t in range(T):
        inp = xt[:, t, :]
        for l in range(num_layers):
            b = (params[f"b_ih_l{l}"] + params[f"b_hh_l{l}"]).astype(jnp.float32)
            g = (dotf(inp, jnp.transpose(params[f"w_ih_l{l}"]))
                 + dotf(hs[l], jnp.transpose(params[f"w_hh_l{l}"]))
                 + b[None, :])
            hs[l], cs[l] = cell(g, cs[l])
            inp = hs[l]
    h_last = hs[-1]                                      # dropout = identity (eval)
    z = dotf(h_last, jnp.transpose(params["fc1_w"])) + params["fc1_b"][None, :]
    z = ((z - params["bn_mean"][None, :]) / jnp.sqrt(params["bn_var"][None, :] + 1e-5)
         * params["bn_gamma"][None, :] + params["bn_beta"][None, :])
    z = jnp.maximum(z, 0.0)
    return dotf(z, jnp.transpose(params["fc2_w"])) + params["fc2_b"][None, :]


# ----------------------------------------------------------------------------
# PyTorch-shaped parameter init (matches nn.LSTM / nn.Linear / BatchNorm1d init)
# ----------------------------------------------------------------------------
def init_params(key, input_size, hidden_size, num_layers, num_classes):
    params = {}
    H = hidden_size
    k = 1.0 / jnp.sqrt(jnp.float32(H))

    def unif(key, shape, scale):
        return jax.random.uniform(key, shape, jnp.float32, -scale, scale)

    keys = jax.random.split(key, 4 * num_layers + 4)
    idx = 0
    for l in range(num_layers):
        din = input_size if l == 0 else H
        params[f"w_ih_l{l}"] = unif(keys[idx], (4 * H, din), k); idx += 1
        params[f"w_hh_l{l}"] = unif(keys[idx], (4 * H, H), k); idx += 1
        params[f"b_ih_l{l}"] = unif(keys[idx], (4 * H,), k); idx += 1
        params[f"b_hh_l{l}"] = unif(keys[idx], (4 * H,), k); idx += 1

    k1 = 1.0 / jnp.sqrt(jnp.float32(H))
    params["fc1_w"] = unif(keys[idx], (128, H), k1); idx += 1
    params["fc1_b"] = unif(keys[idx], (128,), k1); idx += 1
    k2 = 1.0 / jnp.sqrt(jnp.float32(128))
    params["fc2_w"] = unif(keys[idx], (num_classes, 128), k2); idx += 1
    params["fc2_b"] = unif(keys[idx], (num_classes,), k2); idx += 1

    params["bn_gamma"] = jnp.ones((128,), jnp.float32)
    params["bn_beta"] = jnp.zeros((128,), jnp.float32)
    params["bn_mean"] = jnp.zeros((128,), jnp.float32)   # running stats (eval mode)
    params["bn_var"] = jnp.ones((128,), jnp.float32)
    return params


if __name__ == "__main__":
    B, T = 2, 8
    input_size, hidden_size, num_layers, num_classes = 16, 32, 2, 10

    key = jax.random.PRNGKey(0)
    kx, kp = jax.random.split(key)
    x = jax.random.normal(kx, (B, T, input_size), jnp.float32)
    params = init_params(kp, input_size, hidden_size, num_layers, num_classes)

    fwd = jax.jit(functools.partial(
        lstm_model_forward,
        hidden_size=hidden_size, num_layers=num_layers,
        num_classes=num_classes, t_chunk=4))      # 2 time-chunks to exercise streaming
    logits = fwd(x, params)
    jax.block_until_ready(logits)
    assert logits.shape == (B, num_classes)
    assert bool(jnp.all(jnp.isfinite(logits)))

    ref = lstm_model_reference(x, params, hidden_size, num_layers, num_classes)
    err = float(jnp.max(jnp.abs(logits - ref)))
    assert err < 1e-2, f"mismatch vs reference: max abs err {err}"

    print("KERNEL_OK")
</pallas_src>

<mosaic_0001>
module attributes {stable_mosaic.version = 11 : i64} {
  func.func @fused_lstm_head_kernel(%arg0: i32, %arg1: i32, %arg2: memref<32x16xbf16, #tpu.memory_space<vmem>>, %arg3: memref<16x128xbf16, #tpu.memory_space<vmem>>, %arg4: memref<32x128xbf16, #tpu.memory_space<vmem>>, %arg5: memref<1x128xf32, #tpu.memory_space<vmem>>, %arg6: memref<64x128xbf16, #tpu.memory_space<vmem>>, %arg7: memref<1x128xf32, #tpu.memory_space<vmem>>, %arg8: memref<32x128xbf16, #tpu.memory_space<vmem>>, %arg9: memref<1x128xf32, #tpu.memory_space<vmem>>, %arg10: memref<1x128xf32, #tpu.memory_space<vmem>>, %arg11: memref<1x128xf32, #tpu.memory_space<vmem>>, %arg12: memref<1x128xf32, #tpu.memory_space<vmem>>, %arg13: memref<1x128xf32, #tpu.memory_space<vmem>>, %arg14: memref<128x128xbf16, #tpu.memory_space<vmem>>, %arg15: memref<1x128xf32, #tpu.memory_space<vmem>>, %arg16: memref<8x128xf32, #tpu.memory_space<vmem>>, %arg17: memref<32x128xf32, #tpu.memory_space<vmem>>, %arg18: memref<8x32xf32, #tpu.memory_space<vmem>>, %arg19: memref<8x32xf32, #tpu.memory_space<vmem>>, %arg20: memref<8x32xf32, #tpu.memory_space<vmem>>, %arg21: memref<8x32xf32, #tpu.memory_space<vmem>>) attributes {dimension_semantics = [#tpu.dimension_semantics<parallel>, #tpu.dimension_semantics<arbitrary>], iteration_bounds = array<i64: 1, 2>, scalar_prefetch = 0 : i64, scratch_operands = 5 : i64, tpu.core_type = #tpu.core_type<tc>, window_params = [{transform_indices = @transform_0, window_bounds = array<i64: 32, 16>}, {pipeline_mode = #tpu.pipeline_mode<synchronous>, transform_indices = @transform_1, window_bounds = array<i64: 16, 128>}, {pipeline_mode = #tpu.pipeline_mode<synchronous>, transform_indices = @transform_2, window_bounds = array<i64: 32, 128>}, {pipeline_mode = #tpu.pipeline_mode<synchronous>, transform_indices = @transform_3, window_bounds = array<i64: 1, 128>}, {pipeline_mode = #tpu.pipeline_mode<synchronous>, transform_indices = @transform_4, window_bounds = array<i64: 64, 128>}, {pipeline_mode = #tpu.pipeline_mode<synchronous>, transform_indices = @transform_5, window_bounds = array<i64: 1, 128>}, {pipeline_mode = #tpu.pipeline_mode<synchronous>, transform_indices = @transform_6, window_bounds = array<i64: 32, 128>}, {pipeline_mode = #tpu.pipeline_mode<synchronous>, transform_indices = @transform_7, window_bounds = array<i64: 1, 128>}, {pipeline_mode = #tpu.pipeline_mode<synchronous>, transform_indices = @transform_8, window_bounds = array<i64: 1, 128>}, {pipeline_mode = #tpu.pipeline_mode<synchronous>, transform_indices = @transform_9, window_bounds = array<i64: 1, 128>}, {pipeline_mode = #tpu.pipeline_mode<synchronous>, transform_indices = @transform_10, window_bounds = array<i64: 1, 128>}, {pipeline_mode = #tpu.pipeline_mode<synchronous>, transform_indices = @transform_11, window_bounds = array<i64: 1, 128>}, {pipeline_mode = #tpu.pipeline_mode<synchronous>, transform_indices = @transform_12, window_bounds = array<i64: 128, 128>}, {pipeline_mode = #tpu.pipeline_mode<synchronous>, transform_indices = @transform_13, window_bounds = array<i64: 1, 128>}, {transform_indices = @transform_14, window_bounds = array<i64: 8, 128>}]} {
    %c0_i32 = arith.constant 0 : i32
    %0 = arith.cmpi eq, %arg1, %c0_i32 : i32
    %1 = arith.extui %0 : i1 to i32
    %c0_i32_0 = arith.constant 0 : i32
    %2 = arith.cmpi ne, %1, %c0_i32_0 : i32
    scf.if %2 {
      %cst_85 = arith.constant 0.000000e+00 : f32
      %213 = vector.broadcast %cst_85 : f32 to vector<8x32xf32>
      %c0_86 = arith.constant 0 : index
      %c0_87 = arith.constant 0 : index
      %214 = vector.load %arg18[%c0_86, %c0_87] : memref<8x32xf32, #tpu.memory_space<vmem>>, vector<8x32xf32>
      tpu.vector_store %arg18[%c0_86, %c0_87], %213 {strides = array<i32>} : memref<8x32xf32, #tpu.memory_space<vmem>>, vector<8x32xf32>,
      %cst_88 = arith.constant 0.000000e+00 : f32
      %215 = vector.broadcast %cst_88 : f32 to vector<8x32xf32>
      %c0_89 = arith.constant 0 : index
      %c0_90 = arith.constant 0 : index
      %216 = vector.load %arg19[%c0_89, %c0_90] : memref<8x32xf32, #tpu.memory_space<vmem>>, vector<8x32xf32>
      tpu.vector_store %arg19[%c0_89, %c0_90], %215 {strides = array<i32>} : memref<8x32xf32, #tpu.memory_space<vmem>>, vector<8x32xf32>,
      %cst_91 = arith.constant 0.000000e+00 : f32
      %217 = vector.broadcast %cst_91 : f32 to vector<8x32xf32>
      %c0_92 = arith.constant 0 : index
      %c0_93 = arith.constant 0 : index
      %218 = vector.load %arg20[%c0_92, %c0_93] : memref<8x32xf32, #tpu.memory_space<vmem>>, vector<8x32xf32>
      tpu.vector_store %arg20[%c0_92, %c0_93], %217 {strides = array<i32>} : memref<8x32xf32, #tpu.memory_space<vmem>>, vector<8x32xf32>,
      %cst_94 = arith.constant 0.000000e+00 : f32
      %219 = vector.broadcast %cst_94 : f32 to vector<8x32xf32>
      %c0_95 = arith.constant 0 : index
      %c0_96 = arith.constant 0 : index
      %220 = vector.load %arg21[%c0_95, %c0_96] : memref<8x32xf32, #tpu.memory_space<vmem>>, vector<8x32xf32>
      tpu.vector_store %arg21[%c0_95, %c0_96], %219 {strides = array<i32>} : memref<8x32xf32, #tpu.memory_space<vmem>>, vector<8x32xf32>,
    } else {
    }
    %c0 = arith.constant 0 : index
    %c0_1 = arith.constant 0 : index
    %3 = vector.load %arg2[%c0, %c0_1] : memref<32x16xbf16, #tpu.memory_space<vmem>>, vector<32x16xbf16>
    %c0_2 = arith.constant 0 : index
    %c0_3 = arith.constant 0 : index
    %4 = vector.load %arg3[%c0_2, %c0_3] : memref<16x128xbf16, #tpu.memory_space<vmem>>, vector<16x128xbf16>
    %cst = arith.constant dense<0.000000e+00> : vector<32x128xf32>
    %5 = tpu.matmul %3, %4, %cst {dimension_numbers = #tpu.dot_dimension_numbers<[1], [0], [0], [1], [0, 0, 1, 1], [], []>} : vector<32x16xbf16>, vector<16x128xbf16>, vector<32x128xf32> -> vector<32x128xf32>
    %c0_4 = arith.constant 0 : index
    %c0_5 = arith.constant 0 : index
    %6 = vector.load %arg5[%c0_4, %c0_5] : memref<1x128xf32, #tpu.memory_space<vmem>>, vector<1x128xf32>
    %7 = vector.broadcast %6 : vector<1x128xf32> to vector<32x128xf32>
    %8 = arith.addf %5, %7 : vector<32x128xf32>
    %c0_6 = arith.constant 0 : index
    %c0_7 = arith.constant 0 : index
    %9 = vector.load %arg17[%c0_6, %c0_7] : memref<32x128xf32, #tpu.memory_space<vmem>>, vector<32x128xf32>
    tpu.vector_store %arg17[%c0_6, %c0_7], %8 {strides = array<i32>} : memref<32x128xf32, #tpu.memory_space<vmem>>, vector<32x128xf32>,
    %c0_8 = arith.constant 0 : index
    %c0_9 = arith.constant 0 : index
    %10 = vector.load %arg18[%c0_8, %c0_9] : memref<8x32xf32, #tpu.memory_space<vmem>>, vector<8x32xf32>
    %c0_10 = arith.constant 0 : index
    %c0_11 = arith.constant 0 : index
    %11 = vector.load %arg19[%c0_10, %c0_11] : memref<8x32xf32, #tpu.memory_space<vmem>>, vector<8x32xf32>
    %c0_12 = arith.constant 0 : index
    %c0_13 = arith.constant 0 : index
    %12 = vector.load %arg20[%c0_12, %c0_13] : memref<8x32xf32, #tpu.memory_space<vmem>>, vector<8x32xf32>
    %c0_14 = arith.constant 0 : index
    %c0_15 = arith.constant 0 : index
    %13 = vector.load %arg21[%c0_14, %c0_15] : memref<8x32xf32, #tpu.memory_space<vmem>>, vector<8x32xf32>
    %c0_i32_16 = arith.constant 0 : i32
    %c8_i32 = arith.constant 8 : i32
    %14 = arith.muli %c0_i32_16, %c8_i32 : i32
    %15 = tpu.assume_multiple %14, 8 : i32
    %16 = arith.index_cast %15 : i32 to index
    %c0_17 = arith.constant 0 : index
    %17 = vector.load %arg17[%16, %c0_17] : memref<32x128xf32, #tpu.memory_space<vmem>>, vector<8x128xf32>
    %18 = arith.truncf %10 : vector<8x32xf32> to vector<8x32xbf16>
    %c0_18 = arith.constant 0 : index
    %c0_19 = arith.constant 0 : index
    %19 = vector.load %arg4[%c0_18, %c0_19] : memref<32x128xbf16, #tpu.memory_space<vmem>>, vector<32x128xbf16>
    %cst_20 = arith.constant dense<0.000000e+00> : vector<8x128xf32>
    %20 = tpu.matmul %18, %19, %cst_20 {dimension_numbers = #tpu.dot_dimension_numbers<[1], [0], [0], [1], [0, 0, 1, 1], [], []>} : vector<8x32xbf16>, vector<32x128xbf16>, vector<8x128xf32> -> vector<8x128xf32>
    %21 = arith.addf %17, %20 : vector<8x128xf32>
    %22 = arith.negf %21 : vector<8x128xf32>
    %23 = math.exp %22 : vector<8x128xf32>
    %cst_21 = arith.constant 1.000000e+00 : f32
    %24 = vector.broadcast %cst_21 : f32 to vector<8x128xf32>
    %25 = arith.addf %24, %23 : vector<8x128xf32>
    %26 = arith.divf %24, %25 : vector<8x128xf32>
    %27 = math.tanh %21 : vector<8x128xf32>
    %28 = vector.extract_strided_slice %26 {offsets = [0, 0], sizes = [8, 32], strides = [1, 1]} : vector<8x128xf32> to vector<8x32xf32>
    %29 = vector.extract_strided_slice %26 {offsets = [0, 32], sizes = [8, 32], strides = [1, 1]} : vector<8x128xf32> to vector<8x32xf32>
    %30 = vector.extract_strided_slice %27 {offsets = [0, 64], sizes = [8, 32], strides = [1, 1]} : vector<8x128xf32> to vector<8x32xf32>
    %31 = vector.extract_strided_slice %26 {offsets = [0, 96], sizes = [8, 32], strides = [1, 1]} : vector<8x128xf32> to vector<8x32xf32>
    %32 = arith.mulf %29, %11 : vector<8x32xf32>
    %33 = arith.mulf %28, %30 : vector<8x32xf32>
    %34 = arith.addf %32, %33 : vector<8x32xf32>
    %35 = math.tanh %34 : vector<8x32xf32>
    %36 = arith.mulf %31, %35 : vector<8x32xf32>
    %37 = arith.truncf %36 : vector<8x32xf32> to vector<8x32xbf16>
    %c0_22 = arith.constant 0 : index
    %c0_23 = arith.constant 0 : index
    %38 = vector.load %arg6[%c0_22, %c0_23] : memref<64x128xbf16, #tpu.memory_space<vmem>>, vector<32x128xbf16>
    %cst_24 = arith.constant dense<0.000000e+00> : vector<8x128xf32>
    %39 = tpu.matmul %37, %38, %cst_24 {dimension_numbers = #tpu.dot_dimension_numbers<[1], [0], [0], [1], [0, 0, 1, 1], [], []>} : vector<8x32xbf16>, vector<32x128xbf16>, vector<8x128xf32> -> vector<8x128xf32>
    %40 = arith.truncf %12 : vector<8x32xf32> to vector<8x32xbf16>
    %c32 = arith.constant 32 : index
    %c0_25 = arith.constant 0 : index
    %41 = vector.load %arg6[%c32, %c0_25] : memref<64x128xbf16, #tpu.memory_space<vmem>>, vector<32x128xbf16>
    %cst_26 = arith.constant dense<0.000000e+00> : vector<8x128xf32>
    %42 = tpu.matmul %40, %41, %cst_26 {dimension_numbers = #tpu.dot_dimension_numbers<[1], [0], [0], [1], [0, 0, 1, 1], [], []>} : vector<8x32xbf16>, vector<32x128xbf16>, vector<8x128xf32> -> vector<8x128xf32>
    %43 = arith.addf %39, %42 : vector<8x128xf32>
    %c0_27 = arith.constant 0 : index
    %c0_28 = arith.constant 0 : index
    %44 = vector.load %arg7[%c0_27, %c0_28] : memref<1x128xf32, #tpu.memory_space<vmem>>, vector<1x128xf32>
    %45 = vector.broadcast %44 : vector<1x128xf32> to vector<8x128xf32>
    %46 = arith.addf %43, %45 : vector<8x128xf32>
    %47 = arith.negf %46 : vector<8x128xf32>
    %48 = math.exp %47 : vector<8x128xf32>
    %cst_29 = arith.constant 1.000000e+00 : f32
    %49 = vector.broadcast %cst_29 : f32 to vector<8x128xf32>
    %50 = arith.addf %49, %48 : vector<8x128xf32>
    %51 = arith.divf %49, %50 : vector<8x128xf32>
    %52 = math.tanh %46 : vector<8x128xf32>
    %53 = vector.extract_strided_slice %51 {offsets = [0, 0], sizes = [8, 32], strides = [1, 1]} : vector<8x128xf32> to vector<8x32xf32>
    %54 = vector.extract_strided_slice %51 {offsets = [0, 32], sizes = [8, 32], strides = [1, 1]} : vector<8x128xf32> to vector<8x32xf32>
    %55 = vector.extract_strided_slice %52 {offsets = [0, 64], sizes = [8, 32], strides = [1, 1]} : vector<8x128xf32> to vector<8x32xf32>
    %56 = vector.extract_strided_slice %51 {offsets = [0, 96], sizes = [8, 32], strides = [1, 1]} : vector<8x128xf32> to vector<8x32xf32>
    %57 = arith.mulf %54, %13 : vector<8x32xf32>
    %58 = arith.mulf %53, %55 : vector<8x32xf32>
    %59 = arith.addf %57, %58 : vector<8x32xf32>
    %60 = math.tanh %59 : vector<8x32xf32>
    %61 = arith.mulf %56, %60 : vector<8x32xf32>
    %c1_i32 = arith.constant 1 : i32
    %c8_i32_30 = arith.constant 8 : i32
    %62 = arith.muli %c1_i32, %c8_i32_30 : i32
    %63 = tpu.assume_multiple %62, 8 : i32
    %64 = arith.index_cast %63 : i32 to index
    %c0_31 = arith.constant 0 : index
    %65 = vector.load %arg17[%64, %c0_31] : memref<32x128xf32, #tpu.memory_space<vmem>>, vector<8x128xf32>
    %66 = arith.truncf %36 : vector<8x32xf32> to vector<8x32xbf16>
    %c0_32 = arith.constant 0 : index
    %c0_33 = arith.constant 0 : index
    %67 = vector.load %arg4[%c0_32, %c0_33] : memref<32x128xbf16, #tpu.memory_space<vmem>>, vector<32x128xbf16>
    %cst_34 = arith.constant dense<0.000000e+00> : vector<8x128xf32>
    %68 = tpu.matmul %66, %67, %cst_34 {dimension_numbers = #tpu.dot_dimension_numbers<[1], [0], [0], [1], [0, 0, 1, 1], [], []>} : vector<8x32xbf16>, vector<32x128xbf16>, vector<8x128xf32> -> vector<8x128xf32>
    %69 = arith.addf %65, %68 : vector<8x128xf32>
    %70 = arith.negf %69 : vector<8x128xf32>
    %71 = math.exp %70 : vector<8x128xf32>
    %cst_35 = arith.constant 1.000000e+00 : f32
    %72 = vector.broadcast %cst_35 : f32 to vector<8x128xf32>
    %73 = arith.addf %72, %71 : vector<8x128xf32>
    %74 = arith.divf %72, %73 : vector<8x128xf32>
    %75 = math.tanh %69 : vector<8x128xf32>
    %76 = vector.extract_strided_slice %74 {offsets = [0, 0], sizes = [8, 32], strides = [1, 1]} : vector<8x128xf32> to vector<8x32xf32>
    %77 = vector.extract_strided_slice %74 {offsets = [0, 32], sizes = [8, 32], strides = [1, 1]} : vector<8x128xf32> to vector<8x32xf32>
    %78 = vector.extract_strided_slice %75 {offsets = [0, 64], sizes = [8, 32], strides = [1, 1]} : vector<8x128xf32> to vector<8x32xf32>
    %79 = vector.extract_strided_slice %74 {offsets = [0, 96], sizes = [8, 32], strides = [1, 1]} : vector<8x128xf32> to vector<8x32xf32>
    %80 = arith.mulf %77, %34 : vector<8x32xf32>
    %81 = arith.mulf %76, %78 : vector<8x32xf32>
    %82 = arith.addf %80, %81 : vector<8x32xf32>
    %83 = math.tanh %82 : vector<8x32xf32>
    %84 = arith.mulf %79, %83 : vector<8x32xf32>
    %85 = arith.truncf %84 : vector<8x32xf32> to vector<8x32xbf16>
    %c0_36 = arith.constant 0 : index
    %c0_37 = arith.constant 0 : index
    %86 = vector.load %arg6[%c0_36, %c0_37] : memref<64x128xbf16, #tpu.memory_space<vmem>>, vector<32x128xbf16>
    %cst_38 = arith.constant dense<0.000000e+00> : vector<8x128xf32>
    %87 = tpu.matmul %85, %86, %cst_38 {dimension_numbers = #tpu.dot_dimension_numbers<[1], [0], [0], [1], [0, 0, 1, 1], [], []>} : vector<8x32xbf16>, vector<32x128xbf16>, vector<8x128xf32> -> vector<8x128xf32>
    %88 = arith.truncf %61 : vector<8x32xf32> to vector<8x32xbf16>
    %c32_39 = arith.constant 32 : index
    %c0_40 = arith.constant 0 : index
    %89 = vector.load %arg6[%c32_39, %c0_40] : memref<64x128xbf16, #tpu.memory_space<vmem>>, vector<32x128xbf16>
    %cst_41 = arith.constant dense<0.000000e+00> : vector<8x128xf32>
    %90 = tpu.matmul %88, %89, %cst_41 {dimension_numbers = #tpu.dot_dimension_numbers<[1], [0], [0], [1], [0, 0, 1, 1], [], []>} : vector<8x32xbf16>, vector<32x128xbf16>, vector<8x128xf32> -> vector<8x128xf32>
    %91 = arith.addf %87, %90 : vector<8x128xf32>
    %c0_42 = arith.constant 0 : index
    %c0_43 = arith.constant 0 : index
    %92 = vector.load %arg7[%c0_42, %c0_43] : memref<1x128xf32, #tpu.memory_space<vmem>>, vector<1x128xf32>
    %93 = vector.broadcast %92 : vector<1x128xf32> to vector<8x128xf32>
    %94 = arith.addf %91, %93 : vector<8x128xf32>
    %95 = arith.negf %94 : vector<8x128xf32>
    %96 = math.exp %95 : vector<8x128xf32>
    %cst_44 = arith.constant 1.000000e+00 : f32
    %97 = vector.broadcast %cst_44 : f32 to vector<8x128xf32>
    %98 = arith.addf %97, %96 : vector<8x128xf32>
    %99 = arith.divf %97, %98 : vector<8x128xf32>
    %100 = math.tanh %94 : vector<8x128xf32>
    %101 = vector.extract_strided_slice %99 {offsets = [0, 0], sizes = [8, 32], strides = [1, 1]} : vector<8x128xf32> to vector<8x32xf32>
    %102 = vector.extract_strided_slice %99 {offsets = [0, 32], sizes = [8, 32], strides = [1, 1]} : vector<8x128xf32> to vector<8x32xf32>
    %103 = vector.extract_strided_slice %100 {offsets = [0, 64], sizes = [8, 32], strides = [1, 1]} : vector<8x128xf32> to vector<8x32xf32>
    %104 = vector.extract_strided_slice %99 {offsets = [0, 96], sizes = [8, 32], strides = [1, 1]} : vector<8x128xf32> to vector<8x32xf32>
    %105 = arith.mulf %102, %59 : vector<8x32xf32>
    %106 = arith.mulf %101, %103 : vector<8x32xf32>
    %107 = arith.addf %105, %106 : vector<8x32xf32>
    %108 = math.tanh %107 : vector<8x32xf32>
    %109 = arith.mulf %104, %108 : vector<8x32xf32>
    %c2_i32 = arith.constant 2 : i32
    %c8_i32_45 = arith.constant 8 : i32
    %110 = arith.muli %c2_i32, %c8_i32_45 : i32
    %111 = tpu.assume_multiple %110, 8 : i32
    %112 = arith.index_cast %111 : i32 to index
    %c0_46 = arith.constant 0 : index
    %113 = vector.load %arg17[%112, %c0_46] : memref<32x128xf32, #tpu.memory_space<vmem>>, vector<8x128xf32>
    %114 = arith.truncf %84 : vector<8x32xf32> to vector<8x32xbf16>
    %c0_47 = arith.constant 0 : index
    %c0_48 = arith.constant 0 : index
    %115 = vector.load %arg4[%c0_47, %c0_48] : memref<32x128xbf16, #tpu.memory_space<vmem>>, vector<32x128xbf16>
    %cst_49 = arith.constant dense<0.000000e+00> : vector<8x128xf32>
    %116 = tpu.matmul %114, %115, %cst_49 {dimension_numbers = #tpu.dot_dimension_numbers<[1], [0], [0], [1], [0, 0, 1, 1], [], []>} : vector<8x32xbf16>, vector<32x128xbf16>, vector<8x128xf32> -> vector<8x128xf32>
    %117 = arith.addf %113, %116 : vector<8x128xf32>
    %118 = arith.negf %117 : vector<8x128xf32>
    %119 = math.exp %118 : vector<8x128xf32>
    %cst_50 = arith.constant 1.000000e+00 : f32
    %120 = vector.broadcast %cst_50 : f32 to vector<8x128xf32>
    %121 = arith.addf %120, %119 : vector<8x128xf32>
    %122 = arith.divf %120, %121 : vector<8x128xf32>
    %123 = math.tanh %117 : vector<8x128xf32>
    %124 = vector.extract_strided_slice %122 {offsets = [0, 0], sizes = [8, 32], strides = [1, 1]} : vector<8x128xf32> to vector<8x32xf32>
    %125 = vector.extract_strided_slice %122 {offsets = [0, 32], sizes = [8, 32], strides = [1, 1]} : vector<8x128xf32> to vector<8x32xf32>
    %126 = vector.extract_strided_slice %123 {offsets = [0, 64], sizes = [8, 32], strides = [1, 1]} : vector<8x128xf32> to vector<8x32xf32>
    %127 = vector.extract_strided_slice %122 {offsets = [0, 96], sizes = [8, 32], strides = [1, 1]} : vector<8x128xf32> to vector<8x32xf32>
    %128 = arith.mulf %125, %82 : vector<8x32xf32>
    %129 = arith.mulf %124, %126 : vector<8x32xf32>
    %130 = arith.addf %128, %129 : vector<8x32xf32>
    %131 = math.tanh %130 : vector<8x32xf32>
    %132 = arith.mulf %127, %131 : vector<8x32xf32>
    %133 = arith.truncf %132 : vector<8x32xf32> to vector<8x32xbf16>
    %c0_51 = arith.constant 0 : index
    %c0_52 = arith.constant 0 : index
    %134 = vector.load %arg6[%c0_51, %c0_52] : memref<64x128xbf16, #tpu.memory_space<vmem>>, vector<32x128xbf16>
    %cst_53 = arith.constant dense<0.000000e+00> : vector<8x128xf32>
    %135 = tpu.matmul %133, %134, %cst_53 {dimension_numbers = #tpu.dot_dimension_numbers<[1], [0], [0], [1], [0, 0, 1, 1], [], []>} : vector<8x32xbf16>, vector<32x128xbf16>, vector<8x128xf32> -> vector<8x128xf32>
    %136 = arith.truncf %109 : vector<8x32xf32> to vector<8x32xbf16>
    %c32_54 = arith.constant 32 : index
    %c0_55 = arith.constant 0 : index
    %137 = vector.load %arg6[%c32_54, %c0_55] : memref<64x128xbf16, #tpu.memory_space<vmem>>, vector<32x128xbf16>
    %cst_56 = arith.constant dense<0.000000e+00> : vector<8x128xf32>
    %138 = tpu.matmul %136, %137, %cst_56 {dimension_numbers = #tpu.dot_dimension_numbers<[1], [0], [0], [1], [0, 0, 1, 1], [], []>} : vector<8x32xbf16>, vector<32x128xbf16>, vector<8x128xf32> -> vector<8x128xf32>
    %139 = arith.addf %135, %138 : vector<8x128xf32>
    %c0_57 = arith.constant 0 : index
    %c0_58 = arith.constant 0 : index
    %140 = vector.load %arg7[%c0_57, %c0_58] : memref<1x128xf32, #tpu.memory_space<vmem>>, vector<1x128xf32>
    %141 = vector.broadcast %140 : vector<1x128xf32> to vector<8x128xf32>
    %142 = arith.addf %139, %141 : vector<8x128xf32>
    %143 = arith.negf %142 : vector<8x128xf32>
    %144 = math.exp %143 : vector<8x128xf32>
    %cst_59 = arith.constant 1.000000e+00 : f32
    %145 = vector.broadcast %cst_59 : f32 to vector<8x128xf32>
    %146 = arith.addf %145, %144 : vector<8x128xf32>
    %147 = arith.divf %145, %146 : vector<8x128xf32>
    %148 = math.tanh %142 : vector<8x128xf32>
    %149 = vector.extract_strided_slice %147 {offsets = [0, 0], sizes = [8, 32], strides = [1, 1]} : vector<8x128xf32> to vector<8x32xf32>
    %150 = vector.extract_strided_slice %147 {offsets = [0, 32], sizes = [8, 32], strides = [1, 1]} : vector<8x128xf32> to vector<8x32xf32>
    %151 = vector.extract_strided_slice %148 {offsets = [0, 64], sizes = [8, 32], strides = [1, 1]} : vector<8x128xf32> to vector<8x32xf32>
    %152 = vector.extract_strided_slice %147 {offsets = [0, 96], sizes = [8, 32], strides = [1, 1]} : vector<8x128xf32> to vector<8x32xf32>
    %153 = arith.mulf %150, %107 : vector<8x32xf32>
    %154 = arith.mulf %149, %151 : vector<8x32xf32>
    %155 = arith.addf %153, %154 : vector<8x32xf32>
    %156 = math.tanh %155 : vector<8x32xf32>
    %157 = arith.mulf %152, %156 : vector<8x32xf32>
    %c3_i32 = arith.constant 3 : i32
    %c8_i32_60 = arith.constant 8 : i32
    %158 = arith.muli %c3_i32, %c8_i32_60 : i32
    %159 = tpu.assume_multiple %158, 8 : i32
    %160 = arith.index_cast %159 : i32 to index
    %c0_61 = arith.constant 0 : index
    %161 = vector.load %arg17[%160, %c0_61] : memref<32x128xf32, #tpu.memory_space<vmem>>, vector<8x128xf32>
    %162 = arith.truncf %132 : vector<8x32xf32> to vector<8x32xbf16>
    %c0_62 = arith.constant 0 : index
    %c0_63 = arith.constant 0 : index
    %163 = vector.load %arg4[%c0_62, %c0_63] : memref<32x128xbf16, #tpu.memory_space<vmem>>, vector<32x128xbf16>
    %cst_64 = arith.constant dense<0.000000e+00> : vector<8x128xf32>
    %164 = tpu.matmul %162, %163, %cst_64 {dimension_numbers = #tpu.dot_dimension_numbers<[1], [0], [0], [1], [0, 0, 1, 1], [], []>} : vector<8x32xbf16>, vector<32x128xbf16>, vector<8x128xf32> -> vector<8x128xf32>
    %165 = arith.addf %161, %164 : vector<8x128xf32>
    %166 = arith.negf %165 : vector<8x128xf32>
    %167 = math.exp %166 : vector<8x128xf32>
    %cst_65 = arith.constant 1.000000e+00 : f32
    %168 = vector.broadcast %cst_65 : f32 to vector<8x128xf32>
    %169 = arith.addf %168, %167 : vector<8x128xf32>
    %170 = arith.divf %168, %169 : vector<8x128xf32>
    %171 = math.tanh %165 : vector<8x128xf32>
    %172 = vector.extract_strided_slice %170 {offsets = [0, 0], sizes = [8, 32], strides = [1, 1]} : vector<8x128xf32> to vector<8x32xf32>
    %173 = vector.extract_strided_slice %170 {offsets = [0, 32], sizes = [8, 32], strides = [1, 1]} : vector<8x128xf32> to vector<8x32xf32>
    %174 = vector.extract_strided_slice %171 {offsets = [0, 64], sizes = [8, 32], strides = [1, 1]} : vector<8x128xf32> to vector<8x32xf32>
    %175 = vector.extract_strided_slice %170 {offsets = [0, 96], sizes = [8, 32], strides = [1, 1]} : vector<8x128xf32> to vector<8x32xf32>
    %176 = arith.mulf %173, %130 : vector<8x32xf32>
    %177 = arith.mulf %172, %174 : vector<8x32xf32>
    %178 = arith.addf %176, %177 : vector<8x32xf32>
    %179 = math.tanh %178 : vector<8x32xf32>
    %180 = arith.mulf %175, %179 : vector<8x32xf32>
    %181 = arith.truncf %180 : vector<8x32xf32> to vector<8x32xbf16>
    %c0_66 = arith.constant 0 : index
    %c0_67 = arith.constant 0 : index
    %182 = vector.load %arg6[%c0_66, %c0_67] : memref<64x128xbf16, #tpu.memory_space<vmem>>, vector<32x128xbf16>
    %cst_68 = arith.constant dense<0.000000e+00> : vector<8x128xf32>
    %183 = tpu.matmul %181, %182, %cst_68 {dimension_numbers = #tpu.dot_dimension_numbers<[1], [0], [0], [1], [0, 0, 1, 1], [], []>} : vector<8x32xbf16>, vector<32x128xbf16>, vector<8x128xf32> -> vector<8x128xf32>
    %184 = arith.truncf %157 : vector<8x32xf32> to vector<8x32xbf16>
    %c32_69 = arith.constant 32 : index
    %c0_70 = arith.constant 0 : index
    %185 = vector.load %arg6[%c32_69, %c0_70] : memref<64x128xbf16, #tpu.memory_space<vmem>>, vector<32x128xbf16>
    %cst_71 = arith.constant dense<0.000000e+00> : vector<8x128xf32>
    %186 = tpu.matmul %184, %185, %cst_71 {dimension_numbers = #tpu.dot_dimension_numbers<[1], [0], [0], [1], [0, 0, 1, 1], [], []>} : vector<8x32xbf16>, vector<32x128xbf16>, vector<8x128xf32> -> vector<8x128xf32>
    %187 = arith.addf %183, %186 : vector<8x128xf32>
    %c0_72 = arith.constant 0 : index
    %c0_73 = arith.constant 0 : index
    %188 = vector.load %arg7[%c0_72, %c0_73] : memref<1x128xf32, #tpu.memory_space<vmem>>, vector<1x128xf32>
    %189 = vector.broadcast %188 : vector<1x128xf32> to vector<8x128xf32>
    %190 = arith.addf %187, %189 : vector<8x128xf32>
    %191 = arith.negf %190 : vector<8x128xf32>
    %192 = math.exp %191 : vector<8x128xf32>
    %cst_74 = arith.constant 1.000000e+00 : f32
    %193 = vector.broadcast %cst_74 : f32 to vector<8x128xf32>
    %194 = arith.addf %193, %192 : vector<8x128xf32>
    %195 = arith.divf %193, %194 : vector<8x128xf32>
    %196 = math.tanh %190 : vector<8x128xf32>
    %197 = vector.extract_strided_slice %195 {offsets = [0, 0], sizes = [8, 32], strides = [1, 1]} : vector<8x128xf32> to vector<8x32xf32>
    %198 = vector.extract_strided_slice %195 {offsets = [0, 32], sizes = [8, 32], strides = [1, 1]} : vector<8x128xf32> to vector<8x32xf32>
    %199 = vector.extract_strided_slice %196 {offsets = [0, 64], sizes = [8, 32], strides = [1, 1]} : vector<8x128xf32> to vector<8x32xf32>
    %200 = vector.extract_strided_slice %195 {offsets = [0, 96], sizes = [8, 32], strides = [1, 1]} : vector<8x128xf32> to vector<8x32xf32>
    %201 = arith.mulf %198, %155 : vector<8x32xf32>
    %202 = arith.mulf %197, %199 : vector<8x32xf32>
    %203 = arith.addf %201, %202 : vector<8x32xf32>
    %204 = math.tanh %203 : vector<8x32xf32>
    %205 = arith.mulf %200, %204 : vector<8x32xf32>
    %c4_i32 = arith.constant 4 : i32
    %c0_75 = arith.constant 0 : index
    %c0_76 = arith.constant 0 : index
    %206 = vector.load %arg18[%c0_75, %c0_76] : memref<8x32xf32, #tpu.memory_space<vmem>>, vector<8x32xf32>
    tpu.vector_store %arg18[%c0_75, %c0_76], %180 {strides = array<i32>} : memref<8x32xf32, #tpu.memory_space<vmem>>, vector<8x32xf32>,
    %c0_77 = arith.constant 0 : index
    %c0_78 = arith.constant 0 : index
    %207 = vector.load %arg19[%c0_77, %c0_78] : memref<8x32xf32, #tpu.memory_space<vmem>>, vector<8x32xf32>
    tpu.vector_store %arg19[%c0_77, %c0_78], %178 {strides = array<i32>} : memref<8x32xf32, #tpu.memory_space<vmem>>, vector<8x32xf32>,
    %c0_79 = arith.constant 0 : index
    %c0_80 = arith.constant 0 : index
    %208 = vector.load %arg20[%c0_79, %c0_80] : memref<8x32xf32, #tpu.memory_space<vmem>>, vector<8x32xf32>
    tpu.vector_store %arg20[%c0_79, %c0_80], %205 {strides = array<i32>} : memref<8x32xf32, #tpu.memory_space<vmem>>, vector<8x32xf32>,
    %c0_81 = arith.constant 0 : index
    %c0_82 = arith.constant 0 : index
    %209 = vector.load %arg21[%c0_81, %c0_82] : memref<8x32xf32, #tpu.memory_space<vmem>>, vector<8x32xf32>
    tpu.vector_store %arg21[%c0_81, %c0_82], %203 {strides = array<i32>} : memref<8x32xf32, #tpu.memory_space<vmem>>, vector<8x32xf32>,
    %c1_i32_83 = arith.constant 1 : i32
    %210 = arith.cmpi eq, %arg1, %c1_i32_83 : i32
    %211 = arith.extui %210 : i1 to i32
    %c0_i32_84 = arith.constant 0 : i32
    %212 = arith.cmpi ne, %211, %c0_i32_84 : i32
    scf.if %212 {
      %213 = arith.truncf %205 : vector<8x32xf32> to vector<8x32xbf16>
      %c0_85 = arith.constant 0 : index
      %c0_86 = arith.constant 0 : index
      %214 = vector.load %arg8[%c0_85, %c0_86] : memref<32x128xbf16, #tpu.memory_space<vmem>>, vector<32x128xbf16>
      %cst_87 = arith.constant dense<0.000000e+00> : vector<8x128xf32>
      %215 = tpu.matmul %213, %214, %cst_87 {dimension_numbers = #tpu.dot_dimension_numbers<[1], [0], [0], [1], [0, 0, 1, 1], [], []>} : vector<8x32xbf16>, vector<32x128xbf16>, vector<8x128xf32> -> vector<8x128xf32>
      %c0_88 = arith.constant 0 : index
      %c0_89 = arith.constant 0 : index
      %216 = vector.load %arg9[%c0_88, %c0_89] : memref<1x128xf32, #tpu.memory_space<vmem>>, vector<1x128xf32>
      %217 = vector.broadcast %216 : vector<1x128xf32> to vector<8x128xf32>
      %218 = arith.addf %215, %217 : vector<8x128xf32>
      %c0_90 = arith.constant 0 : index
      %c0_91 = arith.constant 0 : index
      %219 = vector.load %arg12[%c0_90, %c0_91] : memref<1x128xf32, #tpu.memory_space<vmem>>, vector<1x128xf32>
      %220 = vector.broadcast %219 : vector<1x128xf32> to vector<8x128xf32>
      %221 = arith.subf %218, %220 : vector<8x128xf32>
      %c0_92 = arith.constant 0 : index
      %c0_93 = arith.constant 0 : index
      %222 = vector.load %arg13[%c0_92, %c0_93] : memref<1x128xf32, #tpu.memory_space<vmem>>, vector<1x128xf32>
      %cst_94 = arith.constant 9.99999974E-6 : f32
      %223 = vector.broadcast %cst_94 : f32 to vector<1x128xf32>
      %224 = arith.addf %222, %223 : vector<1x128xf32>
      %225 = math.rsqrt %224 : vector<1x128xf32>
      %226 = vector.broadcast %225 : vector<1x128xf32> to vector<8x128xf32>
      %227 = arith.mulf %221, %226 : vector<8x128xf32>
      %c0_95 = arith.constant 0 : index
      %c0_96 = arith.constant 0 : index
      %228 = vector.load %arg10[%c0_95, %c0_96] : memref<1x128xf32, #tpu.memory_space<vmem>>, vector<1x128xf32>
      %229 = vector.broadcast %228 : vector<1x128xf32> to vector<8x128xf32>
      %230 = arith.mulf %227, %229 : vector<8x128xf32>
      %c0_97 = arith.constant 0 : index
      %c0_98 = arith.constant 0 : index
      %231 = vector.load %arg11[%c0_97, %c0_98] : memref<1x128xf32, #tpu.memory_space<vmem>>, vector<1x128xf32>
      %232 = vector.broadcast %231 : vector<1x128xf32> to vector<8x128xf32>
      %233 = arith.addf %230, %232 : vector<8x128xf32>
      %cst_99 = arith.constant 0.000000e+00 : f32
      %234 = vector.broadcast %cst_99 : f32 to vector<8x128xf32>
      %235 = arith.maximumf %233, %234 : vector<8x128xf32>
      %236 = arith.truncf %235 : vector<8x128xf32> to vector<8x128xbf16>
      %c0_100 = arith.constant 0 : index
      %c0_101 = arith.constant 0 : index
      %237 = vector.load %arg14[%c0_100, %c0_101] : memref<128x128xbf16, #tpu.memory_space<vmem>>, vector<128x128xbf16>
      %cst_102 = arith.constant dense<0.000000e+00> : vector<8x128xf32>
      %238 = tpu.matmul %236, %237, %cst_102 {dimension_numbers = #tpu.dot_dimension_numbers<[1], [0], [0], [1], [0, 0, 1, 1], [], []>} : vector<8x128xbf16>, vector<128x128xbf16>, vector<8x128xf32> -> vector<8x128xf32>
      %c0_103 = arith.constant 0 : index
      %c0_104 = arith.constant 0 : index
      %239 = vector.load %arg15[%c0_103, %c0_104] : memref<1x128xf32, #tpu.memory_space<vmem>>, vector<1x128xf32>
      %240 = vector.broadcast %239 : vector<1x128xf32> to vector<8x128xf32>
      %241 = arith.addf %238, %240 : vector<8x128xf32>
      %c0_105 = arith.constant 0 : index
      %c0_106 = arith.constant 0 : index
      %242 = vector.load %arg16[%c0_105, %c0_106] : memref<8x128xf32, #tpu.memory_space<vmem>>, vector<8x128xf32>
      tpu.vector_store %arg16[%c0_105, %c0_106], %241 {strides = array<i32>} : memref<8x128xf32, #tpu.memory_space<vmem>>, vector<8x128xf32>,
    } else {
    }
    return
  }
  func.func @transform_0(%arg0: i32, %arg1: i32) -> (i32, i32) {
    %c2_i32 = arith.constant 2 : i32
    %0 = arith.muli %arg0, %c2_i32 : i32
    %1 = arith.addi %0, %arg1 : i32
    %c0_i32 = arith.constant 0 : i32
    %c0_i32_0 = arith.constant 0 : i32
    return %1, %c0_i32 : i32, i32
  }
  func.func @transform_1(%arg0: i32, %arg1: i32) -> (i32, i32) {
    %c0_i32 = arith.constant 0 : i32
    %c0_i32_0 = arith.constant 0 : i32
    %c0_i32_1 = arith.constant 0 : i32
    return %c0_i32, %c0_i32_0 : i32, i32
  }
  func.func @transform_2(%arg0: i32, %arg1: i32) -> (i32, i32) {
    %c0_i32 = arith.constant 0 : i32
    %c0_i32_0 = arith.constant 0 : i32
    %c0_i32_1 = arith.constant 0 : i32
    return %c0_i32, %c0_i32_0 : i32, i32
  }
  func.func @transform_3(%arg0: i32, %arg1: i32) -> (i32, i32) {
    %c0_i32 = arith.constant 0 : i32
    %c0_i32_0 = arith.constant 0 : i32
    %c0_i32_1 = arith.constant 0 : i32
    return %c0_i32, %c0_i32_0 : i32, i32
  }
  func.func @transform_4(%arg0: i32, %arg1: i32) -> (i32, i32) {
    %c0_i32 = arith.constant 0 : i32
    %c0_i32_0 = arith.constant 0 : i32
    %c0_i32_1 = arith.constant 0 : i32
    return %c0_i32, %c0_i32_0 : i32, i32
  }
  func.func @transform_5(%arg0: i32, %arg1: i32) -> (i32, i32) {
    %c0_i32 = arith.constant 0 : i32
    %c0_i32_0 = arith.constant 0 : i32
    %c0_i32_1 = arith.constant 0 : i32
    return %c0_i32, %c0_i32_0 : i32, i32
  }
  func.func @transform_6(%arg0: i32, %arg1: i32) -> (i32, i32) {
    %c0_i32 = arith.constant 0 : i32
    %c0_i32_0 = arith.constant 0 : i32
    %c0_i32_1 = arith.constant 0 : i32
    return %c0_i32, %c0_i32_0 : i32, i32
  }
  func.func @transform_7(%arg0: i32, %arg1: i32) -> (i32, i32) {
    %c0_i32 = arith.constant 0 : i32
    %c0_i32_0 = arith.constant 0 : i32
    %c0_i32_1 = arith.constant 0 : i32
    return %c0_i32, %c0_i32_0 : i32, i32
  }
  func.func @transform_8(%arg0: i32, %arg1: i32) -> (i32, i32) {
    %c0_i32 = arith.constant 0 : i32
    %c0_i32_0 = arith.constant 0 : i32
    %c0_i32_1 = arith.constant 0 : i32
    return %c0_i32, %c0_i32_0 : i32, i32
  }
  func.func @transform_9(%arg0: i32, %arg1: i32) -> (i32, i32) {
    %c0_i32 = arith.constant 0 : i32
    %c0_i32_0 = arith.constant 0 : i32
    %c0_i32_1 = arith.constant 0 : i32
    return %c0_i32, %c0_i32_0 : i32, i32
  }
  func.func @transform_10(%arg0: i32, %arg1: i32) -> (i32, i32) {
    %c0_i32 = arith.constant 0 : i32
    %c0_i32_0 = arith.constant 0 : i32
    %c0_i32_1 = arith.constant 0 : i32
    return %c0_i32, %c0_i32_0 : i32, i32
  }
  func.func @transform_11(%arg0: i32, %arg1: i32) -> (i32, i32) {
    %c0_i32 = arith.constant 0 : i32
    %c0_i32_0 = arith.constant 0 : i32
    %c0_i32_1 = arith.constant 0 : i32
    return %c0_i32, %c0_i32_0 : i32, i32
  }
  func.func @transform_12(%arg0: i32, %arg1: i32) -> (i32, i32) {
    %c0_i32 = arith.constant 0 : i32
    %c0_i32_0 = arith.constant 0 : i32
    %c0_i32_1 = arith.constant 0 : i32
    return %c0_i32, %c0_i32_0 : i32, i32
  }
  func.func @transform_13(%arg0: i32, %arg1: i32) -> (i32, i32) {
    %c0_i32 = arith.constant 0 : i32
    %c0_i32_0 = arith.constant 0 : i32
    %c0_i32_1 = arith.constant 0 : i32
    return %c0_i32, %c0_i32_0 : i32, i32
  }
  func.func @transform_14(%arg0: i32, %arg1: i32) -> (i32, i32) {
    %c0_i32 = arith.constant 0 : i32
    %c0_i32_0 = arith.constant 0 : i32
    return %arg0, %c0_i32 : i32, i32
  }
}

</mosaic_0001>

<bundles_post_ra>
// kernel: lstm_model_forward.1
= control target key start
LH: loop header
LB: loop body
LE: loop exit
PB: predicated region body
PF: predicated region fallthrough
CT: control target
= control target key end

     0   :  { %s1722_s29 = smov 0   ;;  %s1724_s30 = smov 0   ;;  %s1940_s0 = inlined_call_operand.vmem [shape: bf16[64,16], index: 0, kind: input, shape index: {}]   ;;  %s1941_s1 = inlined_call_operand.vmem [shape: bf16[16,128], index: 1, kind: input, shape index: {}]   ;;  %s1942_s2 = inlined_call_operand.vmem [shape: bf16[32,128], index: 2, kind: input, shape index: {}]   ;;  %s1943_s3 = inlined_call_operand.vmem [shape: f32[1,128], index: 3, kind: input, shape index: {}]   ;;  %s1944_s4 = inlined_call_operand.vmem [shape: bf16[64,128], index: 4, kind: input, shape index: {}]   ;;  %s1945_s5 = inlined_call_operand.vmem [shape: f32[1,128], index: 5, kind: input, shape index: {}]   ;;  %s1946_s6 = inlined_call_operand.vmem [shape: bf16[32,128], index: 6, kind: input, shape index: {}]   ;;  %s1947_s7 = inlined_call_operand.vmem [shape: f32[1,128], index: 7, kind: input, shape index: {}]   ;;  %s1948_s8 = inlined_call_operand.vmem [shape: f32[1,128], index: 8, kind: input, shape index: {}]   ;;  %s1949_s9 = inlined_call_operand.vmem [shape: f32[1,128], index: 9, kind: input, shape index: {}]   ;;  %s1950_s10 = inlined_call_operand.vmem [shape: f32[1,128], index: 10, kind: input, shape index: {}]   ;;  %s1951_s11 = inlined_call_operand.vmem [shape: f32[1,128], index: 11, kind: input, shape index: {}]   ;;  %s1952_s12 = inlined_call_operand.vmem [shape: bf16[128,128], index: 12, kind: input, shape index: {}]   ;;  %s1953_s13 = inlined_call_operand.vmem [shape: f32[1,128], index: 13, kind: input, shape index: {}]   ;;  %s1954_s14 = inlined_call_operand.vmem [shape: f32[8,128], index: 14, kind: output, shape index: {}]  }
   0x1   :  { %s1726_s15 = smov 0  }
   0x2 LB: > { %s33_s16 = sadd.s32 1, %s1636_s30  ;;  %p1390_p0 = scmp.ge.s32.totalorder %s1640_s15, 1  ;;  %s1640_s15 = sphi %s1726_s15, %s24_s15   ;;  %s1636_s30 = sphi %s1724_s30, %s1956_s30   ;;  %s1632_s29 = sphi %s1722_s29, %s1955_s29  }
   0x3   : > { %p34_p1 = scmp.ge.s32.totalorder %s33_s16, 2  ;;  %p433_p2 = scmp.lt.s32.totalorder %s1640_s15, 3 }
   0x5   : > { %s1958_s16 = smov (%p34_p1, %s33_s16), 0  ;;  %p434_p3 = pnand %p1390_p0, %p433_p2 }
   0x6   : > { %s1391_s17 = sshll.u32 (!%p434_p3), %s1632_s29, 2  ;;  %p1393_p5 = scmp.ne.s32.totalorder (!%p434_p3), %s1632_s29, 0 }
   0x7   : > { %437 = sbr.rel (%p434_p3) target bundleno = 3338 (0xd0a), region = 76  ;;  %p483_p4 = scmp.lt.s32.totalorder (!%p434_p3), %s1391_s17, 7 }
   0xc   : > { %s1960_s17 = smov (!%p483_p4, %s1391_s17), 7  ;;  %498 = sbr.rel (%p1393_p5) target bundleno = 22 (0x16), region = 80 }
   0xd   : > { %s1392_s18 = sshll.u32 %s1960_s17, 2 }
   0xe   : > { %s1746_s21 = scalar_lea.vmem %s1940_s0, %s1392_s18 }
  0x11   : > { %vm499_vm0 = vcmask 261120   ;;  %v1642_v0 = vmov 0.0  }
  0x12   : > { %500 = vst.msk [vmem:[#allocation3] sm:$0xff] %vm499_vm0, %v1642_v0 }
  0x13   : > { %501 = vst.msk [vmem:[#allocation4] sm:$0xff] %vm499_vm0, %v1642_v0 }
  0x14   : > { %502 = vst.msk [vmem:[#allocation5] sm:$0xff] %vm499_vm0, %v1642_v0 }
  0x15   : > { %503 = vst.msk [vmem:[#allocation6] sm:$0xff] %vm499_vm0, %v1642_v0 }
  0x16 PF: > { %v1499_v1 = vld [vmem:[%s1941_s1] sm:$0xff]  ;;  %v1755_v2 = vld [vmem:[%s1942_s2 + $0x8] sm:$0xff]  ;;  %vm530_vm1 = vcmask 130048   ;;  %vm582_vm2 = vcmask 261120   ;;  %s1643_s18 = smov 64   ;;  %s1644_s19 = smov 32  }
  0x17   : > { %v1497_v3 = vld [vmem:[%s1746_s21] sm:$0xff]  ;;  %544 = vmatpush.bf16.msra.mxu0 %v1499_v1  ;;  %592 = vmatpush.bf16.msra.mxu1 %v1755_v2  ;;  %v1505_v35 = vld [vmem:[%s1944_s4 + $0x18] sm:$0xff]  ;;  %v1503_v36 = vld [vmem:[%s1944_s4 + $0x8] sm:$0xff]  ;;  %p1452_p6 = scmp.ne.s32.totalorder %s1632_s29, 1 }
  0x18   : > { %v1762_v4 = vld [vmem:[%s1942_s2] sm:$0xff]  ;;  %672 = vmatpush.bf16.msra.mxu2 %v1505_v35  ;;  %703 = vmatpush.bf16.msra.mxu3 %v1503_v36  ;;  %v1504_v37 = vld [vmem:[%s1944_s4 + $0x10] sm:$0xff]  ;;  %s1646_s24 = smov (!%p1452_p6), 32  }
  0x19   : > { %v560_v5 = vld [vmem:[#allocation3] sm:$0xff] }
  0x1a   : > { %1406 = vmatmul.msk.bf16.vlgmr.msra.gmra.mxu0 %vm530_vm1, %v1497_v3  ;;  %v565_v6 = vpack.c.bf16 %v560_v5, %v560_v5  ;;  %v1774_v7 = vld [vmem:[%s1943_s3] ss:$0 sm:$0xff]  ;;  %v561_v14 = vld [vmem:[#allocation4] sm:$0xff] }
  0x1b   : > { %895 = vmatpush.bf16.msrb.mxu0 %v1755_v2  ;;  %593 = vmatpush.bf16.msra.mxu1 %v1762_v4  ;;  %v1502_v38 = vld [vmem:[%s1944_s4] sm:$0xff]  ;;  %v562_v42 = vld [vmem:[#allocation5] sm:$0xff] }
  0x1c   : > { %673 = vmatpush.bf16.msra.mxu2 %v1504_v37  ;;  %704 = vmatpush.bf16.msra.mxu3 %v1502_v38  ;;  %v646_v43 = vpack.c.bf16 %v562_v42, %v562_v42  ;;  %v563_v44 = vld [vmem:[#allocation6] sm:$0xff]  ;;  %v1807_v52 = vld [vmem:[%s1945_s5] ss:$0 sm:$0xff] }
  0x1e   : > { %1416 = vmatmul.msk.bf16.vlgmr.msra.gmra.mxu1 %vm582_vm2, %v565_v6 }
  0x1f   : > { %764 = vmatpush.bf16.msrb.mxu1 %v1755_v2  ;;  %896 = vmatpush.bf16.msrb.mxu0 %v1762_v4 }
  0x20   : > { %823 = vmatpush.bf16.msrb.mxu2 %v1505_v35  ;;  %842 = vmatpush.bf16.msrb.mxu3 %v1503_v36 }
  0x21   : > { %1426 = vmatmul.msk.bf16.vlgmr.msra.gmra.mxu2 %vm582_vm2, %v646_v43  ;;  %v1498_v43 = vld [vmem:[%s1746_s21 + $0x8] sm:$0xff]  ;;  %s1645_s21 = smov 96  }
  0x23   : > { %765 = vmatpush.bf16.msrb.mxu1 %v1762_v4  ;;  %1085 = vmatpush.bf16.msra.mxu0 %v1505_v35 }
  0x24   : > { %824 = vmatpush.bf16.msrb.mxu2 %v1504_v37  ;;  %843 = vmatpush.bf16.msrb.mxu3 %v1502_v38 }
  0x27   : > { %954 = vmatpush.bf16.msra.mxu1 %v1505_v35  ;;  %1086 = vmatpush.bf16.msra.mxu0 %v1504_v37 }
  0x28   : > { %973 = vmatpush.bf16.msra.mxu2 %v1503_v36 }
  0x2a   : > { %1407 = vmatmul.msk.bf16.gmra.mxu0 %vm530_vm1, %v1498_v43 }
  0x2b   : > { %955 = vmatpush.bf16.msra.mxu1 %v1504_v37 }
  0x2c   : > { %974 = vmatpush.bf16.msra.mxu2 %v1502_v38 }
  0x97   : > { %v546_v8 = vpop.f32.mrf.mxu0 }
  0x98   : > { %v547_v9 = vadd.f32 %v1774_v7, %v546_v8 }
  0x9b   : > { %v595_v10 = vpop.f32.mrf.mxu1 }
  0x9c   : > { %v599_v11 = vadd.f32 %v595_v10, %v547_v9 }
  0x9e   : > { %1547 = vtanh.f32 %v599_v11  ;;  %v1417_v15 = vmul.f32 -1.442695, %v599_v11 }
  0x9f   : > { %v548_v48 = vpop.f32.mrf.mxu0 }
  0xa0   : > { %1549 = vpow2.f32 %v1417_v15  ;;  %v549_v49 = vadd.f32 %v1774_v7, %v548_v48 }
  0xa3   : > { %v597_v12 = vpop.f32.mrf.mxu1 }
  0xa4   : > { %v1548_v13 = vpop.eup %1547  ;;  %v675_v46 = vpop.f32.mrf.mxu2 }
  0xa5   : > { %626 = vrot.lane.b32.xlu0 %v1548_v13, %s1643_s18 }
  0xa6   : > { %v1550_v16 = vpop.eup %1549 }
  0xa7   : > { %v603_v17 = vadd.f32 1.0, %v1550_v16 }
  0xa9   : > { %1551 = vrcp.f32 %v603_v17  ;;  %v615_v23 = vand.u32 2147483648, %v603_v17  ;;  %vm609_vm4 = vweird.f32 %v603_v17  ;;  %v613_v24 = vand.u32 2147483647, %v603_v17 }
  0xab   : > { %v616_v26 = vor.u32 1.1754944e-38, %v615_v23  ;;  %vm614_vm6 = vcmp.eq.f32.partialorder %v613_v24, 8.507059e+37 }
  0xac   : > { %v677_v47 = vpop.f32.mrf.mxu2 }
  0xad   : > { %621 = vrot.lane.b32.xlu0 %v561_v14, %s1644_s19 }
  0xaf   : > { %v1552_v18 = vpop.eup %1551 }
  0xb0   : > { %v605_v19 = vmul.f32 %v1552_v18, %v603_v17  ;;  %vm610_vm3 = vweird.f32 %v1552_v18 }
  0xb1   : > { %vm611_vm5 = vmor %vm609_vm4, %vm610_vm3 }
  0xb2   : > { %v606_v20 = vsub.f32 1.0, %v605_v19 }
  0xb4   : > { %v607_v21 = vmul.f32 %v1552_v18, %v606_v20 }
  0xb6   : > { %v608_v22 = vadd.f32 %v1552_v18, %v607_v21 }
  0xb8   : > { %v612_v25 = vsel %vm611_vm5, %v1552_v18, %v608_v22 }
  0xb9   : > { %v617_v28 = vsel %vm614_vm6, %v616_v26, %v612_v25 }
 0x117   : > { %v627_v27 = vpop.permute.xlu0 %626 }
 0x118   : > { %v629_v29 = vmul.f32 %v627_v27, %v617_v28 }
 0x11a   : > { %631 = vrot.lane.b32.xlu1 %v629_v29, %s1644_s19 }
 0x11f   : > { %v622_v30 = vpop.permute.xlu0 %621 }
 0x120   : > { %v624_v31 = vmul.f32 %v622_v30, %v617_v28 }
 0x18c   : > { %v632_v32 = vpop.permute.xlu1 %631 }
 0x18d   : > { %v1780_v33 = vadd.f32 %v632_v32, %v624_v31 }
 0x18f   : > { %1553 = vtanh.f32 %v1780_v33 }
 0x195   : > { %v1554_v34 = vpop.eup %1553 }
 0x196   : > { %637 = vrot.lane.b32.xlu1 %v1554_v34, %s1643_s18 }
 0x19e   : > { %736 = vrot.lane.b32.xlu1 %v563_v44, %s1644_s19 }
 0x208   : > { %v638_v39 = vpop.permute.xlu1 %637 }
 0x209   : > { %v640_v40 = vmul.f32 %v638_v39, %v617_v28 }
 0x20b   : > { %v641_v41 = vpack.c.bf16 %v640_v40, %v640_v40 }
 0x20d   : > { %680 = vrot.lane.b32.xlu2 %v641_v41, %s1644_s19 }
 0x210   : > { %v737_v27 = vpop.permute.xlu1 %736 }
 0x267   : > { %v681_v45 = vpop.permute.xlu2 %680 }
 0x268   : > { %1435 = vmatmul.msk.bf16.vlgmr.msra.gmra.mxu3 %vm582_vm2, %v681_v45  ;;  %1437 = vmatmul.msk.bf16.vlgmr.msrb.gmra.mxu1 %vm582_vm2, %v681_v45  ;;  %v551_v45 = vpop.f32.mrf.mxu0 }
 0x269   : > { %1026 = vmatpush.bf16.msra.mxu3 %v1755_v2  ;;  %1104 = vmatpush.bf16.msrb.mxu1 %v1503_v36  ;;  %v552_v48 = vadd.f32 %v1774_v7, %v551_v45 }
 0x26d   : > { %1027 = vmatpush.bf16.msra.mxu3 %v1762_v4  ;;  %1105 = vmatpush.bf16.msrb.mxu1 %v1502_v38 }
 0x270   : > { %v1830_v47 = vpop.f32.mrf.mxu0 }
 0x2e5   : > { %v767_v50 = vpop.f32.mrf.mxu1 }
 0x2e6   : > { %v771_v51 = vadd.f32 %v767_v50, %v549_v49 }
 0x2e8   : > { %1555 = vtanh.f32 %v771_v51  ;;  %v1438_v63 = vmul.f32 -1.442695, %v771_v51 }
 0x2eb   : > { %v706_v53 = vpop.f32.mrf.mxu3 }
 0x2ec   : > { %v707_v54 = vadd.f32 %v706_v53, %v675_v46 }
 0x2ed   : > { %v769_v55 = vpop.f32.mrf.mxu1 }
 0x2ee   : > { %v1556_v56 = vpop.eup %1555  ;;  %v714_v57 = vadd.f32 %v1807_v52, %v707_v54 }
 0x2ef   : > { %794 = vrot.lane.b32.xlu0 %v1556_v56, %s1643_s18 }
 0x2f0   : > { %1557 = vtanh.f32 %v714_v57  ;;  %v1436_v60 = vmul.f32 -1.442695, %v714_v57 }
 0x2f2   : > { %1559 = vpow2.f32 %v1436_v60 }
 0x2f3   : > { %v708_v58 = vpop.f32.mrf.mxu3 }
 0x2f6   : > { %v1558_v59 = vpop.eup %1557 }
 0x2f7   : > { %741 = vrot.lane.b32.xlu2 %v1558_v59, %s1643_s18 }
 0x2f8   : > { %v1560_v61 = vpop.eup %1559 }
 0x2f9   : > { %v718_v62 = vadd.f32 1.0, %v1560_v61 }
 0x2fb   : > { %1561 = vrcp.f32 %v718_v62  ;;  %v730_v9 = vand.u32 2147483648, %v718_v62  ;;  %vm724_vm8 = vweird.f32 %v718_v62  ;;  %v728_v10 = vand.u32 2147483647, %v718_v62 }
 0x2fc   : > { %1563 = vpow2.f32 %v1438_v63 }
 0x2fd   : > { %v731_v13 = vor.u32 1.1754944e-38, %v730_v9  ;;  %vm729_vm10 = vcmp.eq.f32.partialorder %v728_v10, 8.507059e+37 }
 0x301   : > { %v1562_v0 = vpop.eup %1561 }
 0x302   : > { %v1564_v1 = vpop.eup %1563  ;;  %v720_v2 = vmul.f32 %v1562_v0, %v718_v62  ;;  %vm725_vm7 = vweird.f32 %v1562_v0 }
 0x303   : > { %v775_v3 = vadd.f32 1.0, %v1564_v1  ;;  %vm726_vm9 = vmor %vm724_vm8, %vm725_vm7 }
 0x304   : > { %v721_v4 = vsub.f32 1.0, %v720_v2 }
 0x305   : > { %1565 = vrcp.f32 %v775_v3  ;;  %v787_v20 = vand.u32 2147483648, %v775_v3  ;;  %vm781_vm12 = vweird.f32 %v775_v3  ;;  %v785_v21 = vand.u32 2147483647, %v775_v3 }
 0x306   : > { %v722_v5 = vmul.f32 %v1562_v0, %v721_v4 }
 0x307   : > { %v788_v23 = vor.u32 1.1754944e-38, %v787_v20  ;;  %vm786_vm14 = vcmp.eq.f32.partialorder %v785_v21, 8.507059e+37 }
 0x308   : > { %v723_v6 = vadd.f32 %v1562_v0, %v722_v5 }
 0x30a   : > { %v727_v11 = vsel %vm726_vm9, %v1562_v0, %v723_v6 }
 0x30b   : > { %v1566_v8 = vpop.eup %1565  ;;  %v732_v14 = vsel %vm729_vm10, %v731_v13, %v727_v11 }
 0x30c   : > { %v777_v12 = vmul.f32 %v1566_v8, %v775_v3  ;;  %vm782_vm11 = vweird.f32 %v1566_v8  ;;  %v739_v28 = vmul.f32 %v737_v27, %v732_v14 }
 0x30d   : > { %vm783_vm13 = vmor %vm781_vm12, %vm782_vm11 }
 0x30e   : > { %v778_v17 = vsub.f32 1.0, %v777_v12 }
 0x310   : > { %v779_v18 = vmul.f32 %v1566_v8, %v778_v17 }
 0x312   : > { %v780_v19 = vadd.f32 %v1566_v8, %v779_v18 }
 0x314   : > { %v784_v22 = vsel %vm783_vm13, %v1566_v8, %v780_v19 }
 0x315   : > { %v789_v25 = vsel %vm786_vm14, %v788_v23, %v784_v22 }
 0x316   : > { %v792_v32 = vmul.f32 %v789_v25, %v1780_v33 }
 0x351   : > { %v742_v15 = vpop.permute.xlu2 %741 }
 0x352   : > { %v744_v16 = vmul.f32 %v742_v15, %v732_v14 }
 0x354   : > { %746 = vrot.lane.b32.xlu2 %v744_v16, %s1644_s19 }
 0x361   : > { %v795_v24 = vpop.permute.xlu0 %794 }
 0x362   : > { %v797_v26 = vmul.f32 %v795_v24, %v789_v25 }
 0x364   : > { %799 = vrot.lane.b32.xlu0 %v797_v26, %s1644_s19 }
 0x3ae   : > { %v747_v29 = vpop.permute.xlu2 %746 }
 0x3af   : > { %v1814_v30 = vadd.f32 %v747_v29, %v739_v28 }
 0x3b1   : > { %1567 = vtanh.f32 %v1814_v30 }
 0x3b7   : > { %v1568_v31 = vpop.eup %1567 }
 0x3b8   : > { %752 = vrot.lane.b32.xlu1 %v1568_v31, %s1643_s18 }
 0x3d6   : > { %v800_v34 = vpop.permute.xlu0 %799 }
 0x3d7   : > { %v1819_v35 = vadd.f32 %v800_v34, %v792_v32 }
 0x3d9   : > { %1569 = vtanh.f32 %v1819_v35 }
 0x3df   : > { %v1570_v36 = vpop.eup %1569 }
 0x3e0   : > { %805 = vrot.lane.b32.xlu2 %v1570_v36, %s1643_s18 }
 0x42a   : > { %v753_v37 = vpop.permute.xlu1 %752 }
 0x42b   : > { %v755_v38 = vmul.f32 %v753_v37, %v732_v14 }
 0x42d   : > { %v810_v39 = vpack.c.bf16 %v755_v38, %v755_v38 }
 0x42f   : > { %812 = vrot.lane.b32.xlu0 %v810_v39, %s1644_s19 }
 0x43a   : > { %v806_v40 = vpop.permute.xlu2 %805 }
 0x43b   : > { %v808_v41 = vmul.f32 %v806_v40, %v789_v25 }
 0x43d   : > { %v809_v42 = vpack.c.bf16 %v808_v41, %v808_v41 }
 0x43f   : > { %831 = vrot.lane.b32.xlu1 %v809_v42, %s1644_s19 }
 0x4a1   : > { %v813_v33 = vpop.permute.xlu0 %812 }
 0x4a2   : > { %1439 = vmatmul.msk.bf16.vlgmr.msrb.gmra.mxu2 %vm582_vm2, %v813_v33  ;;  %v554_v33 = vadd.f32 %v1774_v7, %v1830_v47 }
 0x4b1   : > { %v832_v44 = vpop.permute.xlu1 %831 }
 0x4b2   : > { %1440 = vmatmul.msk.bf16.vlgmr.msrb.gmra.mxu3 %vm582_vm2, %v832_v44  ;;  %1442 = vmatmul.msk.bf16.vlgmr.msrb.gmra.mxu0 %vm582_vm2, %v832_v44 }
 0x525   : > { %v826_v46 = vpop.f32.mrf.mxu2 }
 0x52d   : > { %v828_v49 = vpop.f32.mrf.mxu2 }
 0x52f   : > { %v898_v50 = vpop.f32.mrf.mxu0 }
 0x530   : > { %v902_v51 = vadd.f32 %v898_v50, %v552_v48 }
 0x532   : > { %1571 = vtanh.f32 %v902_v51  ;;  %v1443_v60 = vmul.f32 -1.442695, %v902_v51 }
 0x535   : > { %v845_v53 = vpop.f32.mrf.mxu3 }
 0x536   : > { %v846_v54 = vadd.f32 %v845_v53, %v826_v46 }
 0x537   : > { %v900_v55 = vpop.f32.mrf.mxu0 }
 0x538   : > { %v1572_v56 = vpop.eup %1571  ;;  %v849_v57 = vadd.f32 %v1807_v52, %v846_v54 }
 0x539   : > { %925 = vrot.lane.b32.xlu2 %v1572_v56, %s1643_s18 }
 0x53a   : > { %1573 = vtanh.f32 %v849_v57  ;;  %v1441_v2 = vmul.f32 -1.442695, %v849_v57 }
 0x53b   : > { %1575 = vpow2.f32 %v1443_v60 }
 0x53d   : > { %v847_v58 = vpop.f32.mrf.mxu3 }
 0x540   : > { %v1574_v59 = vpop.eup %1573 }
 0x541   : > { %872 = vrot.lane.b32.xlu0 %v1574_v59, %s1643_s18  ;;  %v1576_v61 = vpop.eup %1575 }
 0x542   : > { %v906_v62 = vadd.f32 1.0, %v1576_v61 }
 0x544   : > { %1577 = vrcp.f32 %v906_v62  ;;  %v918_v5 = vand.u32 2147483648, %v906_v62  ;;  %vm912_vm0 = vweird.f32 %v906_v62  ;;  %v916_v6 = vand.u32 2147483647, %v906_v62 }
 0x545   : > { %1579 = vpow2.f32 %v1441_v2 }
 0x546   : > { %v919_v10 = vor.u32 1.1754944e-38, %v918_v5  ;;  %vm917_vm3 = vcmp.eq.f32.partialorder %v916_v6, 8.507059e+37 }
 0x54a   : > { %v1578_v63 = vpop.eup %1577 }
 0x54b   : > { %v908_v0 = vmul.f32 %v1578_v63, %v906_v62  ;;  %vm913_vm15 = vweird.f32 %v1578_v63  ;;  %v1580_v8 = vpop.eup %1579 }
 0x54c   : > { %vm914_vm1 = vmor %vm912_vm0, %vm913_vm15  ;;  %v853_v11 = vadd.f32 1.0, %v1580_v8 }
 0x54d   : > { %v909_v1 = vsub.f32 1.0, %v908_v0 }
 0x54e   : > { %1581 = vrcp.f32 %v853_v11  ;;  %v865_v20 = vand.u32 2147483648, %v853_v11  ;;  %vm859_vm5 = vweird.f32 %v853_v11  ;;  %v863_v21 = vand.u32 2147483647, %v853_v11 }
 0x54f   : > { %v910_v3 = vmul.f32 %v1578_v63, %v909_v1 }
 0x550   : > { %v866_v23 = vor.u32 1.1754944e-38, %v865_v20  ;;  %vm864_vm7 = vcmp.eq.f32.partialorder %v863_v21, 8.507059e+37 }
 0x551   : > { %v911_v4 = vadd.f32 %v1578_v63, %v910_v3 }
 0x553   : > { %v915_v9 = vsel %vm914_vm1, %v1578_v63, %v911_v4 }
 0x554   : > { %v920_v13 = vsel %vm917_vm3, %v919_v10, %v915_v9  ;;  %v1582_v15 = vpop.eup %1581 }
 0x555   : > { %v855_v16 = vmul.f32 %v1582_v15, %v853_v11  ;;  %vm860_vm4 = vweird.f32 %v1582_v15  ;;  %v923_v27 = vmul.f32 %v920_v13, %v1819_v35 }
 0x556   : > { %vm861_vm6 = vmor %vm859_vm5, %vm860_vm4 }
 0x557   : > { %v856_v17 = vsub.f32 1.0, %v855_v16 }
 0x559   : > { %v857_v18 = vmul.f32 %v1582_v15, %v856_v17 }
 0x55b   : > { %v858_v19 = vadd.f32 %v1582_v15, %v857_v18 }
 0x55d   : > { %v862_v22 = vsel %vm861_vm6, %v1582_v15, %v858_v19 }
 0x55e   : > { %v867_v25 = vsel %vm864_vm7, %v866_v23, %v862_v22 }
 0x55f   : > { %v870_v31 = vmul.f32 %v867_v25, %v1814_v30 }
 0x593   : > { %v926_v12 = vpop.permute.xlu2 %925 }
 0x594   : > { %v928_v14 = vmul.f32 %v926_v12, %v920_v13 }
 0x596   : > { %930 = vrot.lane.b32.xlu1 %v928_v14, %s1644_s19 }
 0x5b3   : > { %v873_v24 = vpop.permute.xlu0 %872 }
 0x5b4   : > { %v875_v26 = vmul.f32 %v873_v24, %v867_v25 }
 0x5b6   : > { %877 = vrot.lane.b32.xlu2 %v875_v26, %s1644_s19 }
 0x608   : > { %v931_v28 = vpop.permute.xlu1 %930 }
 0x609   : > { %v1839_v29 = vadd.f32 %v931_v28, %v923_v27 }
 0x60b   : > { %1583 = vtanh.f32 %v1839_v29 }
 0x610   : > { %v878_v32 = vpop.permute.xlu2 %877 }
 0x611   : > { %v1584_v34 = vpop.eup %1583  ;;  %v1843_v36 = vadd.f32 %v878_v32, %v870_v31 }
 0x612   : > { %936 = vrot.lane.b32.xlu0 %v1584_v34, %s1643_s18 }
 0x613   : > { %1585 = vtanh.f32 %v1843_v36 }
 0x619   : > { %v1586_v37 = vpop.eup %1585 }
 0x61a   : > { %883 = vrot.lane.b32.xlu1 %v1586_v37, %s1643_s18 }
 0x684   : > { %v937_v38 = vpop.permute.xlu0 %936 }
 0x685   : > { %v939_v35 = vmul.f32 %v937_v38, %v920_v13 }
 0x687   : > { %v940_v39 = vpack.c.bf16 %v939_v35, %v939_v35 }
 0x689   : > { %962 = vrot.lane.b32.xlu2 %v940_v39, %s1644_s19 }
 0x68c   : > { %v884_v40 = vpop.permute.xlu1 %883 }
 0x68d   : > { %v886_v41 = vmul.f32 %v884_v40, %v867_v25 }
 0x68f   : > { %v941_v42 = vpack.c.bf16 %v886_v41, %v886_v41 }
 0x691   : > { %943 = vrot.lane.b32.xlu0 %v941_v42, %s1644_s19 }
 0x6e3   : > { %v963_v30 = vpop.permute.xlu2 %962 }
 0x6e4   : > { %1445 = vmatmul.msk.bf16.vlgmr.msra.gmra.mxu2 %vm582_vm2, %v963_v30  ;;  %1447 = vmatmul.msk.bf16.vlgmr.msra.gmra.mxu3 %vm582_vm2, %v963_v30 }
 0x703   : > { %v944_v43 = vpop.permute.xlu0 %943 }
 0x704   : > { %1444 = vmatmul.msk.bf16.vlgmr.msra.gmra.mxu1 %vm582_vm2, %v944_v43 }
 0x767   : > { %v976_v44 = vpop.f32.mrf.mxu2  ;;  %v1029_v45 = vpop.f32.mrf.mxu3 }
 0x768   : > { %v1033_v46 = vadd.f32 %v1029_v45, %v554_v33 }
 0x76a   : > { %1587 = vtanh.f32 %v1033_v46  ;;  %v1448_v57 = vmul.f32 -1.442695, %v1033_v46 }
 0x76f   : > { %v978_v48 = vpop.f32.mrf.mxu2  ;;  %v1031_v49 = vpop.f32.mrf.mxu3 }
 0x770   : > { %v1588_v50 = vpop.eup %1587 }
 0x771   : > { %1056 = vrot.lane.b32.xlu2 %v1588_v50, %s1643_s18 }
 0x781   : > { %v957_v51 = vpop.f32.mrf.mxu1 }
 0x782   : > { %v977_v53 = vadd.f32 %v976_v44, %v957_v51 }
 0x784   : > { %v980_v54 = vadd.f32 %v1807_v52, %v977_v53 }
 0x786   : > { %1589 = vtanh.f32 %v980_v54  ;;  %v1446_v6 = vmul.f32 -1.442695, %v980_v54 }
 0x787   : > { %1591 = vpow2.f32 %v1448_v57 }
 0x789   : > { %v959_v55 = vpop.f32.mrf.mxu1 }
 0x78c   : > { %v1590_v56 = vpop.eup %1589 }
 0x78d   : > { %1003 = vrot.lane.b32.xlu1 %v1590_v56, %s1643_s18  ;;  %v1592_v7 = vpop.eup %1591 }
 0x78e   : > { %v1037_v47 = vadd.f32 1.0, %v1592_v7 }
 0x790   : > { %1593 = vrcp.f32 %v1037_v47  ;;  %v1049_v63 = vand.u32 2147483648, %v1037_v47  ;;  %vm1043_vm9 = vweird.f32 %v1037_v47  ;;  %v1047_v0 = vand.u32 2147483647, %v1037_v47 }
 0x791   : > { %1595 = vpow2.f32 %v1446_v6 }
 0x792   : > { %v1050_v2 = vor.u32 1.1754944e-38, %v1049_v63  ;;  %vm1048_vm11 = vcmp.eq.f32.partialorder %v1047_v0, 8.507059e+37 }
 0x796   : > { %v1594_v58 = vpop.eup %1593 }
 0x797   : > { %v1039_v59 = vmul.f32 %v1594_v58, %v1037_v47  ;;  %vm1044_vm8 = vweird.f32 %v1594_v58  ;;  %v1596_v8 = vpop.eup %1595 }
 0x798   : > { %vm1045_vm10 = vmor %vm1043_vm9, %vm1044_vm8  ;;  %v984_v9 = vadd.f32 1.0, %v1596_v8 }
 0x799   : > { %v1040_v60 = vsub.f32 1.0, %v1039_v59 }
 0x79a   : > { %1597 = vrcp.f32 %v984_v9  ;;  %v996_v15 = vand.u32 2147483648, %v984_v9  ;;  %vm990_vm13 = vweird.f32 %v984_v9  ;;  %v994_v16 = vand.u32 2147483647, %v984_v9 }
 0x79b   : > { %v1041_v61 = vmul.f32 %v1594_v58, %v1040_v60 }
 0x79c   : > { %v997_v18 = vor.u32 1.1754944e-38, %v996_v15  ;;  %vm995_vm15 = vcmp.eq.f32.partialorder %v994_v16, 8.507059e+37 }
 0x79d   : > { %v1042_v62 = vadd.f32 %v1594_v58, %v1041_v61 }
 0x79f   : > { %v1046_v1 = vsel %vm1045_vm10, %v1594_v58, %v1042_v62 }
 0x7a0   : > { %v1051_v4 = vsel %vm1048_vm11, %v1050_v2, %v1046_v1  ;;  %v1598_v10 = vpop.eup %1597 }
 0x7a1   : > { %v986_v11 = vmul.f32 %v1598_v10, %v984_v9  ;;  %vm991_vm12 = vweird.f32 %v1598_v10  ;;  %v1054_v22 = vmul.f32 %v1051_v4, %v1839_v29 }
 0x7a2   : > { %vm992_vm14 = vmor %vm990_vm13, %vm991_vm12 }
 0x7a3   : > { %v987_v12 = vsub.f32 1.0, %v986_v11 }
 0x7a5   : > { %v988_v13 = vmul.f32 %v1598_v10, %v987_v12 }
 0x7a7   : > { %v989_v14 = vadd.f32 %v1598_v10, %v988_v13 }
 0x7a9   : > { %v993_v17 = vsel %vm992_vm14, %v1598_v10, %v989_v14 }
 0x7aa   : > { %v998_v20 = vsel %vm995_vm15, %v997_v18, %v993_v17 }
 0x7ab   : > { %v1001_v26 = vmul.f32 %v998_v20, %v1843_v36 }
 0x7cb   : > { %v1057_v3 = vpop.permute.xlu2 %1056 }
 0x7cc   : > { %v1059_v5 = vmul.f32 %v1057_v3, %v1051_v4 }
 0x7ce   : > { %1061 = vrot.lane.b32.xlu1 %v1059_v5, %s1644_s19 }
 0x7ff   : > { %v1004_v19 = vpop.permute.xlu1 %1003 }
 0x800   : > { %v1006_v21 = vmul.f32 %v1004_v19, %v998_v20 }
 0x802   : > { %1008 = vrot.lane.b32.xlu0 %v1006_v21, %s1644_s19 }
 0x840   : > { %v1062_v23 = vpop.permute.xlu1 %1061 }
 0x841   : > { %v1064_v24 = vadd.f32 %v1062_v23, %v1054_v22 }
 0x843   : > { %1599 = vtanh.f32 %v1064_v24 }
 0x849   : > { %v1600_v25 = vpop.eup %1599 }
 0x84a   : > { %1067 = vrot.lane.b32.xlu0 %v1600_v25, %s1643_s18 }
 0x874   : > { %v1009_v27 = vpop.permute.xlu0 %1008 }
 0x875   : > { %v1011_v28 = vadd.f32 %v1009_v27, %v1001_v26 }
 0x877   : > { %1601 = vtanh.f32 %v1011_v28 }
 0x87d   : > { %v1602_v31 = vpop.eup %1601 }
 0x87e   : > { %1014 = vrot.lane.b32.xlu2 %v1602_v31, %s1643_s18 }
 0x8bc   : > { %v1068_v32 = vpop.permute.xlu0 %1067 }
 0x8bd   : > { %v1070_v34 = vmul.f32 %v1068_v32, %v1051_v4 }
 0x8bf   : > { %v1071_v37 = vpack.c.bf16 %v1070_v34, %v1070_v34 }
 0x8c1   : > { %1093 = vrot.lane.b32.xlu2 %v1071_v37, %s1644_s19 }
 0x8d8   : > { %v1015_v29 = vpop.permute.xlu2 %1014 }
 0x8d9   : > { %v1017_v38 = vmul.f32 %v1015_v29, %v998_v20 }
 0x8db   : > { %v1072_v35 = vpack.c.bf16 %v1017_v38, %v1017_v38 }
 0x8dd   : > { %1074 = vrot.lane.b32.xlu1 %v1072_v35, %s1644_s19 }
 0x91b   : > { %v1094_v39 = vpop.permute.xlu2 %1093 }
 0x91c   : > { %1450 = vmatmul.msk.bf16.vlgmr.msrb.gmra.mxu1 %vm582_vm2, %v1094_v39 }
 0x94f   : > { %v1075_v36 = vpop.permute.xlu1 %1074 }
 0x950   : > { %1449 = vmatmul.msk.bf16.vlgmr.msra.gmra.mxu0 %vm582_vm2, %v1075_v36 }
 0x999   : > { %v1107_v40 = vpop.f32.mrf.mxu1 }
 0x9a1   : > { %v1109_v41 = vpop.f32.mrf.mxu1 }
 0x9cd   : > { %v1088_v42 = vpop.f32.mrf.mxu0 }
 0x9ce   : > { %v1108_v30 = vadd.f32 %v1107_v40, %v1088_v42 }
 0x9d0   : > { %v1111_v43 = vadd.f32 %v1807_v52, %v1108_v30 }
 0x9d2   : > { %1603 = vtanh.f32 %v1111_v43  ;;  %v1451_v45 = vmul.f32 -1.442695, %v1111_v43 }
 0x9d4   : > { %1605 = vpow2.f32 %v1451_v45 }
 0x9d5   : > { %v1090_v33 = vpop.f32.mrf.mxu0 }
 0x9d8   : > { %v1604_v44 = vpop.eup %1603 }
 0x9d9   : > { %1134 = vrot.lane.b32.xlu0 %v1604_v44, %s1643_s18 }
 0x9da   : > { %v1606_v46 = vpop.eup %1605 }
 0x9db   : > { %v1115_v48 = vadd.f32 1.0, %v1606_v46 }
 0x9dd   : > { %1607 = vrcp.f32 %v1115_v48  ;;  %v1127_v55 = vand.u32 2147483648, %v1115_v48  ;;  %vm1121_vm1 = vweird.f32 %v1115_v48  ;;  %v1125_v52 = vand.u32 2147483647, %v1115_v48 }
 0x9df   : > { %v1128_v57 = vor.u32 1.1754944e-38, %v1127_v55  ;;  %vm1126_vm4 = vcmp.eq.f32.partialorder %v1125_v52, 8.507059e+37 }
 0x9e1   : > { %1150 = vrot.lane.b32.xlu0 %v1070_v34, %s1644_s19 }
 0x9e3   : > { %v1608_v49 = vpop.eup %1607 }
 0x9e4   : > { %v1117_v50 = vmul.f32 %v1608_v49, %v1115_v48  ;;  %vm1122_vm0 = vweird.f32 %v1608_v49 }
 0x9e5   : > { %vm1123_vm3 = vmor %vm1121_vm1, %vm1122_vm0 }
 0x9e6   : > { %v1118_v51 = vsub.f32 1.0, %v1117_v50 }
 0x9e8   : > { %v1119_v53 = vmul.f32 %v1608_v49, %v1118_v51 }
 0x9ea   : > { %v1120_v54 = vadd.f32 %v1608_v49, %v1119_v53 }
 0x9ec   : > { %v1124_v56 = vsel %vm1123_vm3, %v1608_v49, %v1120_v54 }
 0x9ed   : > { %v1129_v47 = vsel %vm1126_vm4, %v1128_v57, %v1124_v56 }
 0x9ee   : > { %v1132_v60 = vmul.f32 %v1129_v47, %v1011_v28 }
 0xa4b   : > { %v1135_v7 = vpop.permute.xlu0 %1134 }
 0xa4c   : > { %v1137_v58 = vmul.f32 %v1135_v7, %v1129_v47 }
 0xa4e   : > { %1139 = vrot.lane.b32.xlu1 %v1137_v58, %s1644_s19 }
 0xa53   : > { %v1151_v59 = vpop.permute.xlu0 %1150 }
 0xa54   : > { %1153 = vst.msk [vmem:[#allocation3] sm:$0xff] %vm582_vm2, %v1151_v59 }
 0xa56   : > { %1155 = vrot.lane.b32.xlu1 %v1064_v24, %s1645_s21 }
 0xac0   : > { %v1140_v61 = vpop.permute.xlu1 %1139 }
 0xac1   : > { %v1142_v62 = vadd.f32 %v1140_v61, %v1132_v60 }
 0xac3   : > { %1609 = vtanh.f32 %v1142_v62  ;;  %1165 = vrot.lane.b32.xlu0 %v1142_v62, %s1645_s21 }
 0xac8   : > { %v1156_v63 = vpop.permute.xlu1 %1155 }
 0xac9   : > { %v1610_v0 = vpop.eup %1609  ;;  %1158 = vst.msk [vmem:[#allocation4] sm:$0xff] %vm582_vm2, %v1156_v63 }
 0xaca   : > { %1145 = vrot.lane.b32.xlu2 %v1610_v0, %s1643_s18 }
 0xb24   : > { %v1146_v1 = vpop.permute.xlu2 %1145 }
 0xb25   : > { %v1148_v2 = vmul.f32 %v1146_v1, %v1129_v47 }
 0xb27   : > { %1160 = vrot.lane.b32.xlu2 %v1148_v2, %s1644_s19 }
 0xb35   : > { %v1166_v3 = vpop.permute.xlu0 %1165 }
 0xb36   : > { %1168 = vst.msk [vmem:[#allocation6] sm:$0xff] %vm582_vm2, %v1166_v3 }
 0xb7e   : > { %1172 = sbr.rel (%p1452_p6) target bundleno = 3338 (0xd0a), region = 84 }
 0xb81   : > { %v1161_v4 = vpop.permute.xlu2 %1160 }
 0xb82   : > { %1163 = vst.msk [vmem:[#allocation5] sm:$0xff] %vm582_vm2, %v1161_v4 }
 0xb83   : > { %v1173_v5 = vpack.c.bf16 %v1148_v2, %v1148_v2  ;;  %v1507_v6 = vld [vmem:[%s1946_s6 + $0x8] sm:$0xff]  ;;  %v1506_v8 = vld [vmem:[%s1946_s6] sm:$0xff]  ;;  %v1515_v9 = vld [vmem:[%s1952_s12 + $0x38] sm:$0xff] }
 0xb84   : > { %1206 = vmatpush.bf16.msra.mxu0 %v1507_v6  ;;  %1314 = vmatpush.bf16.msra.mxu1 %v1515_v9  ;;  %v1514_v10 = vld [vmem:[%s1952_s12 + $0x30] sm:$0xff]  ;;  %v1513_v11 = vld [vmem:[%s1952_s12 + $0x28] sm:$0xff]  ;;  %v1512_v12 = vld [vmem:[%s1952_s12 + $0x20] sm:$0xff] }
 0xb85   : > { %1183 = vrot.lane.b32.xlu0 %v1173_v5, %s1646_s24  ;;  %v1218_v14 = vld [vmem:[%s1951_s11] sm:$0x1]  ;;  %v1511_v16 = vld [vmem:[%s1952_s12 + $0x18] sm:$0xff]  ;;  %v1510_v17 = vld [vmem:[%s1952_s12 + $0x10] sm:$0xff] }
 0xb86   : > { %v1219_v15 = vadd.f32 1e-05, %v1218_v14  ;;  %v1509_v18 = vld [vmem:[%s1952_s12 + $0x8] sm:$0xff]  ;;  %v1508_v20 = vld [vmem:[%s1952_s12] sm:$0xff] }
 0xb87   : > { %v1611_v26 = vld [vmem:[%s1947_s7] ss:$0 sm:$0xff] }
 0xb88   : > { %1207 = vmatpush.bf16.msra.mxu0 %v1506_v8  ;;  %1315 = vmatpush.bf16.msra.mxu1 %v1514_v10  ;;  %1616 = vrsqrt.f32 %v1219_v15  ;;  %v1612_v28 = vld [vmem:[%s1950_s10] ss:$0 sm:$0xff] }
 0xb89   : > { %v1613_v29 = vld [vmem:[%s1948_s8] ss:$0 sm:$0xff] }
 0xb8a   : > { %v1614_v35 = vld [vmem:[%s1949_s9] ss:$0 sm:$0xff] }
 0xb8b   : > { %v1615_v30 = vld [vmem:[%s1953_s13] ss:$0 sm:$0xff] }
 0xb8c   : > { %1316 = vmatpush.bf16.msra.mxu1 %v1513_v11 }
 0xb8e   : > { %v1617_v19 = vpop.eup %1616 }
 0xb8f   : > { %v1221_v21 = vmul.f32 %v1617_v19, %v1219_v15  ;;  %vm1227_vm5 = vweird.f32 %v1617_v19 }
 0xb90   : > { %1317 = vmatpush.bf16.msra.mxu1 %v1512_v12 }
 0xb91   : > { %v1222_v22 = vmul.f32 %v1617_v19, %v1221_v21 }
 0xb93   : > { %v1223_v23 = vmul.f32 0.5, %v1222_v22 }
 0xb94   : > { %1318 = vmatpush.bf16.msra.mxu1 %v1511_v16 }
 0xb95   : > { %v1224_v24 = vsub.f32 1.5, %v1223_v23 }
 0xb97   : > { %v1225_v25 = vmul.f32 %v1617_v19, %v1224_v24 }
 0xb98   : > { %1319 = vmatpush.bf16.msra.mxu1 %v1510_v17 }
 0xb9c   : > { %1320 = vmatpush.bf16.msra.mxu1 %v1509_v18 }
 0xba0   : > { %1321 = vmatpush.bf16.msra.mxu1 %v1508_v20 }
 0xbf7   : > { %v1184_v13 = vpop.permute.xlu0 %1183 }
 0xbf8   : > { %1461 = vmatmul.msk.bf16.vlgmr.msra.gmra.mxu0 %vm582_vm2, %v1184_v13  ;;  %vm1226_vm2 = vweird.f32 %v1219_v15 }
 0xbf9   : > { %vm1228_vm6 = vmor %vm1226_vm2, %vm1227_vm5 }
 0xbfa   : > { %v1229_v27 = vsel %vm1228_vm6, %v1617_v19, %v1225_v25 }
 0xbfb   : > { %v1231_v34 = vperm.slane %v1229_v27, 0 }
 0xc75   : > { %v1209_v31 = vpop.f32.mrf.mxu0 }
 0xc76   : > { %v1210_v32 = vadd.f32 %v1611_v26, %v1209_v31 }
 0xc78   : > { %v1217_v37 = vsub.f32 %v1210_v32, %v1612_v28 }
 0xc7a   : > { %v1233_v38 = vmul.f32 %v1231_v34, %v1217_v37 }
 0xc7c   : > { %v1238_v39 = vmul.f32 %v1613_v29, %v1233_v38 }
 0xc7d   : > { %v1211_v36 = vpop.f32.mrf.mxu0 }
 0xc7e   : > { %v1243_v40 = vadd.f32 %v1614_v35, %v1238_v39 }
 0xc80   : > { %v1244_v41 = vmax.f32 %v1243_v40, 0.0 }
 0xc82   : > { %v1245_v42 = vpack.c.bf16 %v1244_v41, %v1244_v41 }
 0xc84   : > { %1322 = vmatmul.bf16.vlgmr.msra.gmra.mxu1 %v1245_v42 }
 0xd01   : > { %v1323_v43 = vpop.f32.mrf.mxu1 }
 0xd02   : > { %v1324_v33 = vadd.f32 %v1615_v30, %v1323_v43 }
 0xd04   : > { %1327 = vst [vmem:[%s1954_s14] sm:$0xff] %v1324_v33 }
 0xd09   : > { %v1325_v44 = vpop.f32.mrf.mxu1 }
 0xd0a PF: > { %s24_s15 = sadd.s32 1, %s1640_s15   ;;  %s1955_s29 = smov %s1636_s30 }
 0xd0b   : > { %p21_p7 = scmp.ge.s32.totalorder %s24_s15, 4   ;;  %s1956_s30 = smov %s1958_s16 }
 0xd0d   :  { %23 = sbr.rel (!%p21_p7) target bundleno = 2 (0x2), region = 117 }

</bundles_post_ra>
